<compile_context>
chip_gen: v7x
topology: tpu7x:2x2x1
jax: 0.10.0
libtpu: 0.0.40
codegen_flags: <defaults>
</compile_context>

<pallas_src>
import jax
import jax.numpy as jnp
from jax.experimental import pallas as pl
from jax.experimental.pallas import tpu as pltpu

D_IN = 784
H1 = 256
H2 = 100      # logical hidden width of layer 2
H2P = 128     # lane-aligned padded hidden width used inside the kernel
D_OUT = 1


def _round_up(n, m):
    return ((n + m - 1) // m) * m


def _discriminator_kernel(x_ref, w1_ref, b1_ref, w2_ref, b2_ref, w3_ref, b3_ref, o_ref):
    # x_ref: (TB, 784) f32; w*: bf16; b1/b2: (1,H) f32; b3_ref: (1,) f32 in SMEM.
    # o_ref: (1, 1, TB) f32 (batch-on-lanes scores).
    x = x_ref[...].astype(jnp.bfloat16)                       # cast in VMEM (VPU)

    h = jnp.dot(x, w1_ref[...], preferred_element_type=jnp.float32) + b1_ref[...]
    h = jnp.maximum(h, 0.2 * h)                               # LeakyReLU(0.2)

    h = jnp.dot(h.astype(jnp.bfloat16), w2_ref[...],
                preferred_element_type=jnp.float32) + b2_ref[...]
    h = jnp.maximum(h, 0.2 * h)                               # LeakyReLU(0.2), (TB, 128)

    # Final layer, batch-on-lanes: (8,128) @ (128,TB) -> (8,TB); row 0 is real.
    h_t = jnp.transpose(h).astype(jnp.bfloat16)               # XLU transpose, (H2P, TB)
    s = jnp.dot(w3_ref[...], h_t, preferred_element_type=jnp.float32)
    s = s[0:1, :] + b3_ref[0]                                 # (1, TB)
    o_ref[...] = jax.nn.sigmoid(s)[None].astype(o_ref.dtype)  # (1, 1, TB)


def prepare_params(params):
    """One-time weight prep (hoist out of the forward/training loop):
    bf16 casts, H2 100->128 zero-padding, transposed+row-padded final layer."""
    (w1, b1), (w2, b2), (w3, b3) = params
    w1b = w1.astype(jnp.bfloat16)                                   # (784, 256)
    w2p = jnp.zeros((H1, H2P), jnp.bfloat16).at[:, :H2].set(w2.astype(jnp.bfloat16))
    b2p = jnp.zeros((1, H2P), jnp.float32).at[:, :H2].set(b2.astype(jnp.float32))
    # Transposed final layer weights, padded to 8 sublanes; row 0 = w3^T.
    w3t = jnp.zeros((8, H2P), jnp.bfloat16).at[0, :H2].set(w3[:, 0].astype(jnp.bfloat16))
    b3s = b3.reshape(-1)[:1].astype(jnp.float32)                    # (1,) scalar for SMEM
    return (w1b, b1.astype(jnp.float32), w2p, b2p, w3t, b3s)


def discriminator_forward(x, prepared, *, tb=1024):
    """x: (B, 784) float32. prepared: output of prepare_params().
    Returns (B, 1) float32 sigmoid scores."""
    B = x.shape[0]
    w1b, b1, w2p, b2p, w3t, b3s = prepared

    # --- batch tile selection -------------------------------------------------
    Bp8 = _round_up(B, 8)
    TB = max(8, (min(tb, Bp8) // 8) * 8)          # multiple of 8 sublanes
    # v7x megacore: keep at least 2 batch tiles when the batch is big enough
    # (each tile stays >= 128 rows so stores remain lane-dense).
    if Bp8 >= 2 * 128 and Bp8 // TB < 2:
        TB = _round_up(Bp8 // 2, 8)
    Bp = _round_up(B, TB)
    if Bp != B:                                   # only pads when B isn't tile-aligned
        x = jnp.pad(x, ((0, Bp - B), (0, 0)))
    ntiles = Bp // TB

    batch = lambda i: (i, 0)                      # activations: tiled over batch
    const = lambda i: (0, 0)                      # weights/biases: resident

    out = pl.pallas_call(
        _discriminator_kernel,
        out_shape=jax.ShapeDtypeStruct((ntiles, 1, TB), jnp.float32),
        grid=(ntiles,),
        in_specs=[
            pl.BlockSpec((TB, D_IN), batch),                          # x (f32)
            pl.BlockSpec((D_IN, H1), const),                          # w1 bf16
            pl.BlockSpec((1, H1), const),                             # b1 f32
            pl.BlockSpec((H1, H2P), const),                           # w2 (padded) bf16
            pl.BlockSpec((1, H2P), const),                            # b2 (padded) f32
            pl.BlockSpec((8, H2P), const),                            # w3^T (row 0) bf16
            pl.BlockSpec(memory_space=pltpu.MemorySpace.SMEM),        # b3 scalar
        ],
        out_specs=pl.BlockSpec((1, 1, TB), lambda i: (i, 0, 0)),
        compiler_params=pltpu.CompilerParams(
            dimension_semantics=("parallel",),
        ),
    )(x, w1b, b1, w2p, b2p, w3t, b3s)

    return out.reshape(Bp, 1)[:B]


def init_params(key):
    """PyTorch-Linear-style init: U(-1/sqrt(fan_in), 1/sqrt(fan_in)); w as (in, out)."""
    dims = [D_IN, H1, H2, D_OUT]
    params = []
    for i in range(len(dims) - 1):
        fan_in, fan_out = dims[i], dims[i + 1]
        key, kw, kb = jax.random.split(key, 3)
        bound = 1.0 / jnp.sqrt(jnp.float32(fan_in))
        w = jax.random.uniform(kw, (fan_in, fan_out), jnp.float32, -bound, bound)
        b = jax.random.uniform(kb, (1, fan_out), jnp.float32, -bound, bound)
        params.append((w, b))
    return params


def reference_forward(x, params):
    """Plain-JAX reference using the same bf16-weights / f32-accumulate recipe."""
    (w1, b1), (w2, b2), (w3, b3) = params
    h = jnp.dot(x.astype(jnp.bfloat16), w1.astype(jnp.bfloat16),
                preferred_element_type=jnp.float32) + b1
    h = jnp.maximum(h, 0.2 * h)
    h = jnp.dot(h.astype(jnp.bfloat16), w2.astype(jnp.bfloat16),
                preferred_element_type=jnp.float32) + b2
    h = jnp.maximum(h, 0.2 * h)
    h = jnp.dot(h.astype(jnp.bfloat16), w3.astype(jnp.bfloat16),
                preferred_element_type=jnp.float32) + b3
    return jax.nn.sigmoid(h)


if __name__ == "__main__":
    key = jax.random.PRNGKey(0)
    key, kx = jax.random.split(key)

    B = 256  # small batch; splits into 2 tiles of 128 (exercises the grid / megacore path)
    x = jax.random.normal(kx, (B, D_IN), jnp.float32)

    params = init_params(key)
    prepared = prepare_params(params)          # one-time weight prep (hoisted)

    fwd = jax.jit(discriminator_forward)
    out = jax.block_until_ready(fwd(x, prepared))

    ref = reference_forward(x, params)
    assert out.shape == (B, D_OUT)
    assert bool(jnp.all(jnp.isfinite(out)))
    assert jnp.allclose(out, ref, atol=1e-3, rtol=1e-3)

    print("KERNEL_OK")
</pallas_src>

<mosaic_0001>
module attributes {stable_mosaic.version = 11 : i64} {
  func.func @_discriminator_kernel(%arg0: i32, %arg1: memref<128x784xf32, #tpu.memory_space<vmem>>, %arg2: memref<784x256xbf16, #tpu.memory_space<vmem>>, %arg3: memref<1x256xf32, #tpu.memory_space<vmem>>, %arg4: memref<256x128xbf16, #tpu.memory_space<vmem>>, %arg5: memref<1x128xf32, #tpu.memory_space<vmem>>, %arg6: memref<8x128xbf16, #tpu.memory_space<vmem>>, %arg7: memref<1xf32, #tpu.memory_space<smem>>, %arg8: memref<1x1x128xf32, #tpu.memory_space<vmem>>) attributes {dimension_semantics = [#tpu.dimension_semantics<parallel>], iteration_bounds = array<i64: 2>, scalar_prefetch = 0 : i64, scratch_operands = 0 : i64, tpu.core_type = #tpu.core_type<tc>, window_params = [{transform_indices = @transform_0, window_bounds = array<i64: 128, 784>}, {pipeline_mode = #tpu.pipeline_mode<synchronous>, transform_indices = @transform_1, window_bounds = array<i64: 784, 256>}, {pipeline_mode = #tpu.pipeline_mode<synchronous>, transform_indices = @transform_2, window_bounds = array<i64: 1, 256>}, {pipeline_mode = #tpu.pipeline_mode<synchronous>, transform_indices = @transform_3, window_bounds = array<i64: 256, 128>}, {pipeline_mode = #tpu.pipeline_mode<synchronous>, transform_indices = @transform_4, window_bounds = array<i64: 1, 128>}, {pipeline_mode = #tpu.pipeline_mode<synchronous>, transform_indices = @transform_5, window_bounds = array<i64: 8, 128>}, {transform_indices = @transform_6, window_bounds = array<i64: 1>}, {transform_indices = @transform_7, window_bounds = array<i64: 1, 1, 128>}]} {
    %c0 = arith.constant 0 : index
    %c0_0 = arith.constant 0 : index
    %0 = vector.load %arg1[%c0, %c0_0] : memref<128x784xf32, #tpu.memory_space<vmem>>, vector<128x784xf32>
    %1 = arith.truncf %0 : vector<128x784xf32> to vector<128x784xbf16>
    %c0_1 = arith.constant 0 : index
    %c0_2 = arith.constant 0 : index
    %2 = vector.load %arg2[%c0_1, %c0_2] : memref<784x256xbf16, #tpu.memory_space<vmem>>, vector<784x256xbf16>
    %cst = arith.constant dense<0.000000e+00> : vector<128x256xf32>
    %3 = tpu.matmul %1, %2, %cst {dimension_numbers = #tpu.dot_dimension_numbers<[1], [0], [0], [1], [0, 0, 1, 1], [], []>} : vector<128x784xbf16>, vector<784x256xbf16>, vector<128x256xf32> -> vector<128x256xf32>
    %c0_3 = arith.constant 0 : index
    %c0_4 = arith.constant 0 : index
    %4 = vector.load %arg3[%c0_3, %c0_4] : memref<1x256xf32, #tpu.memory_space<vmem>>, vector<1x256xf32>
    %5 = vector.broadcast %4 : vector<1x256xf32> to vector<128x256xf32>
    %6 = arith.addf %3, %5 : vector<128x256xf32>
    %cst_5 = arith.constant 2.000000e-01 : f32
    %7 = vector.broadcast %cst_5 : f32 to vector<128x256xf32>
    %8 = arith.mulf %7, %6 : vector<128x256xf32>
    %9 = arith.maximumf %6, %8 : vector<128x256xf32>
    %10 = arith.truncf %9 : vector<128x256xf32> to vector<128x256xbf16>
    %c0_6 = arith.constant 0 : index
    %c0_7 = arith.constant 0 : index
    %11 = vector.load %arg4[%c0_6, %c0_7] : memref<256x128xbf16, #tpu.memory_space<vmem>>, vector<256x128xbf16>
    %cst_8 = arith.constant dense<0.000000e+00> : vector<128x128xf32>
    %12 = tpu.matmul %10, %11, %cst_8 {dimension_numbers = #tpu.dot_dimension_numbers<[1], [0], [0], [1], [0, 0, 1, 1], [], []>} : vector<128x256xbf16>, vector<256x128xbf16>, vector<128x128xf32> -> vector<128x128xf32>
    %c0_9 = arith.constant 0 : index
    %c0_10 = arith.constant 0 : index
    %13 = vector.load %arg5[%c0_9, %c0_10] : memref<1x128xf32, #tpu.memory_space<vmem>>, vector<1x128xf32>
    %14 = vector.broadcast %13 : vector<1x128xf32> to vector<128x128xf32>
    %15 = arith.addf %12, %14 : vector<128x128xf32>
    %cst_11 = arith.constant 2.000000e-01 : f32
    %16 = vector.broadcast %cst_11 : f32 to vector<128x128xf32>
    %17 = arith.mulf %16, %15 : vector<128x128xf32>
    %18 = arith.maximumf %15, %17 : vector<128x128xf32>
    %19 = tpu.transpose %18, [1, 0] : vector<128x128xf32> -> vector<128x128xf32>
    %20 = arith.truncf %19 : vector<128x128xf32> to vector<128x128xbf16>
    %c0_12 = arith.constant 0 : index
    %c0_13 = arith.constant 0 : index
    %21 = vector.load %arg6[%c0_12, %c0_13] : memref<8x128xbf16, #tpu.memory_space<vmem>>, vector<8x128xbf16>
    %cst_14 = arith.constant dense<0.000000e+00> : vector<8x128xf32>
    %22 = tpu.matmul %21, %20, %cst_14 {dimension_numbers = #tpu.dot_dimension_numbers<[1], [0], [0], [1], [0, 0, 1, 1], [], []>} : vector<8x128xbf16>, vector<128x128xbf16>, vector<8x128xf32> -> vector<8x128xf32>
    %23 = vector.extract_strided_slice %22 {offsets = [0, 0], sizes = [1, 128], strides = [1, 1]} : vector<8x128xf32> to vector<1x128xf32>
    %c0_15 = arith.constant 0 : index
    %24 = memref.load %arg7[%c0_15] : memref<1xf32, #tpu.memory_space<smem>>
    %25 = vector.broadcast %24 : f32 to vector<1x128xf32>
    %26 = arith.addf %23, %25 : vector<1x128xf32>
    %27 = arith.negf %26 : vector<1x128xf32>
    %28 = math.exp %27 : vector<1x128xf32>
    %cst_16 = arith.constant 1.000000e+00 : f32
    %29 = vector.broadcast %cst_16 : f32 to vector<1x128xf32>
    %30 = arith.addf %29, %28 : vector<1x128xf32>
    %31 = arith.divf %29, %30 : vector<1x128xf32>
    %32 = vector.shape_cast %31 : vector<1x128xf32> to vector<1x1x128xf32>
    %c0_17 = arith.constant 0 : index
    %c0_18 = arith.constant 0 : index
    %c0_19 = arith.constant 0 : index
    %33 = vector.load %arg8[%c0_17, %c0_18, %c0_19] : memref<1x1x128xf32, #tpu.memory_space<vmem>>, vector<1x1x128xf32>
    tpu.vector_store %arg8[%c0_17, %c0_18, %c0_19], %32 {strides = array<i32>} : memref<1x1x128xf32, #tpu.memory_space<vmem>>, vector<1x1x128xf32>,
    return
  }
  func.func @transform_0(%arg0: i32) -> (i32, i32) {
    %c0_i32 = arith.constant 0 : i32
    %c0_i32_0 = arith.constant 0 : i32
    return %arg0, %c0_i32 : i32, i32
  }
  func.func @transform_1(%arg0: i32) -> (i32, i32) {
    %c0_i32 = arith.constant 0 : i32
    %c0_i32_0 = arith.constant 0 : i32
    %c0_i32_1 = arith.constant 0 : i32
    return %c0_i32, %c0_i32_0 : i32, i32
  }
  func.func @transform_2(%arg0: i32) -> (i32, i32) {
    %c0_i32 = arith.constant 0 : i32
    %c0_i32_0 = arith.constant 0 : i32
    %c0_i32_1 = arith.constant 0 : i32
    return %c0_i32, %c0_i32_0 : i32, i32
  }
  func.func @transform_3(%arg0: i32) -> (i32, i32) {
    %c0_i32 = arith.constant 0 : i32
    %c0_i32_0 = arith.constant 0 : i32
    %c0_i32_1 = arith.constant 0 : i32
    return %c0_i32, %c0_i32_0 : i32, i32
  }
  func.func @transform_4(%arg0: i32) -> (i32, i32) {
    %c0_i32 = arith.constant 0 : i32
    %c0_i32_0 = arith.constant 0 : i32
    %c0_i32_1 = arith.constant 0 : i32
    return %c0_i32, %c0_i32_0 : i32, i32
  }
  func.func @transform_5(%arg0: i32) -> (i32, i32) {
    %c0_i32 = arith.constant 0 : i32
    %c0_i32_0 = arith.constant 0 : i32
    %c0_i32_1 = arith.constant 0 : i32
    return %c0_i32, %c0_i32_0 : i32, i32
  }
  func.func @transform_6(%arg0: i32) -> i32 {
    %c0_i32 = arith.constant 0 : i32
    %c0_i32_0 = arith.constant 0 : i32
    return %c0_i32 : i32
  }
  func.func @transform_7(%arg0: i32) -> (i32, i32, i32) {
    %c0_i32 = arith.constant 0 : i32
    %c0_i32_0 = arith.constant 0 : i32
    %c0_i32_1 = arith.constant 0 : i32
    return %arg0, %c0_i32, %c0_i32_0 : i32, i32, i32
  }
}

</mosaic_0001>

<bundles_post_ra>
// kernel: discriminator_forward.1
= control target key start
LH: loop header
LB: loop body
LE: loop exit
PB: predicated region body
PF: predicated region fallthrough
CT: control target
= control target key end

     0   :  { %s3413_s0 = inlined_call_operand.vmem [shape: f32[256,784], index: 0, kind: input, shape index: {}]   ;;  %s3414_s1 = inlined_call_operand.vmem [shape: bf16[784,256], index: 1, kind: input, shape index: {}]   ;;  %s3415_s2 = inlined_call_operand.vmem [shape: f32[1,256], index: 2, kind: input, shape index: {}]   ;;  %s3416_s3 = inlined_call_operand.vmem [shape: bf16[256,128], index: 3, kind: input, shape index: {}]   ;;  %s3417_s4 = inlined_call_operand.vmem [shape: f32[1,128], index: 4, kind: input, shape index: {}]   ;;  %s3418_s5 = inlined_call_operand.vmem [shape: bf16[8,128], index: 5, kind: input, shape index: {}]   ;;  %s3419_s6 = inlined_call_operand.<no memory space> [shape: f32[1], index: 6, kind: input, shape index: {}]   ;;  %s3420_s7 = inlined_call_operand.hbm [shape: f32[2,1,128], index: 7, kind: output, shape index: {}]  }
   0x1   :  { %12 = sst [smem:[#allocation2]] %s3419_s6 }
   0x2   :  { %13 = vsyncpa [#allocation4], 0 }
   0x3   :  { %15 = vsyncpa [#allocation4 + $0x1], 0  ;;  %s2706_s26 = smov 0   ;;  %s2708_s27 = smov 0  }
   0x4   :  { %s2710_s28 = smov 0   ;;  %s2712_s29 = smov 0  }
   0x5 LB: > { %s2030_s6 = sadd.s32 4294967295, %s2657_s29   ;;  %s2031_s30 = sadd.s32 4294967294, %s2657_s29   ;;  %s2657_s29 = sphi %s2712_s29, %s3426_s29   ;;  %s2653_s28 = sphi %s2710_s28, %s3425_s28   ;;  %s2649_s27 = sphi %s2708_s27, %s3424_s27   ;;  %s2645_s26 = sphi %s2706_s26, %s3423_s26  }
   0x6   : > { %s2729_s8 = sadd.s32 1, %s2657_s29   ;;  %s180_s9 = sadd.s32 1, %s2653_s28 }
   0x7   : > { %s177_s10 = ssub.s32 %s2657_s29, %s2729_s8  ;;  %p190_p0 = scmp.ne.s32.totalorder %s2653_s28, %s2649_s27 }
   0x8   : > { %p178_p1 = scmp.eq.s32.totalorder %s177_s10, 0  ;;  %p191_p2 = scmp.eq.s32.totalorder %s2030_s6, 1 }
   0x9   : > { %p196_p3 = scmp.ne.s32.totalorder %s2649_s27, %s2645_s26  ;;  %p197_p4 = scmp.eq.s32.totalorder %s2031_s30, 1 }
   0xa   : > { %s2739_s11 = scalar_select %p178_p1, %s2653_s28, %s180_s9  }
   0xb   : > { %p2741_p5 = por %p191_p2, %p190_p0  ;;  %p2745_p6 = por %p197_p4, %p196_p3 }
   0xc   : > { %p2034_p7 = scmp.ge.s32.totalorder %s2657_s29, 1  ;;  %p243_p8 = scmp.lt.s32.totalorder %s2657_s29, 3 }
   0xe   : > { %p244_p9 = pnand %p2034_p7, %p243_p8 }
   0xf   : > { %v2428_v0 = vld [vmem:[%s3414_s1 + $0x104] ss:$8 sps:$4 sm:$0xff] (!%p244_p9)   ;;  %v2430_v1 = vld [vmem:[%s3414_s1 + $0x100] ss:$8 sps:$4 sm:$0xff] (!%p244_p9)   ;;  %v2431_v2 = vld [vmem:[%s3414_s1 + $0x114] ss:$8 sps:$4 sm:$0xff] (!%p244_p9)  }
  0x10   : > { %247 = sbr.rel (%p244_p9) target bundleno = 1101 (0x44d), region = 48  ;;  %1189 = vmatprep.subr.bf16.mxu0 (!%p244_p9), %v2428_v0  ;;  %v2433_v3 = vld [vmem:[%s3414_s1 + $0x110] ss:$8 sps:$4 sm:$0xff] (!%p244_p9)   ;;  %s2763_s22 = sshll.u32 (!%p244_p9), %s2030_s6, 4  ;;  %v2434_v4 = vld [vmem:[%s3414_s1 + $0x124] ss:$8 sps:$4 sm:$0xff] (!%p244_p9)  }
  0x11   : > { %1190 = vmatpush1.bf16.msra.mxu0 (!%p244_p9), %v2430_v1  ;;  %p276_p10 = scmp.lt.s32.totalorder (!%p244_p9), %s2763_s22, 31  ;;  %v2436_v5 = vld [vmem:[%s3414_s1 + $0x120] ss:$8 sps:$4 sm:$0xff] (!%p244_p9)   ;;  %v2437_v6 = vld [vmem:[%s3414_s1 + $0x134] ss:$8 sps:$4 sm:$0xff] (!%p244_p9)   ;;  %vm1051_vm0 = vcmask (!%p244_p9), 130048  }
  0x12   : > { %1191 = vmatprep.subr.bf16.mxu0 (!%p244_p9), %v2431_v2  ;;  %v2439_v7 = vld [vmem:[%s3414_s1 + $0x130] ss:$8 sps:$4 sm:$0xff] (!%p244_p9)   ;;  %v2440_v8 = vld [vmem:[%s3414_s1 + $0x144] ss:$8 sps:$4 sm:$0xff] (!%p244_p9)   ;;  %v2442_v9 = vld [vmem:[%s3414_s1 + $0x140] ss:$8 sps:$4 sm:$0xff] (!%p244_p9)  }
  0x13   : > { %v2443_v10 = vld [vmem:[%s3414_s1 + $0x154] ss:$8 sps:$4 sm:$0xff] (!%p244_p9)   ;;  %v2445_v11 = vld [vmem:[%s3414_s1 + $0x150] ss:$8 sps:$4 sm:$0xff] (!%p244_p9)   ;;  %v2446_v12 = vld [vmem:[%s3414_s1 + $0x164] ss:$8 sps:$4 sm:$0xff] (!%p244_p9)  }
  0x14   : > { %v2448_v16 = vld [vmem:[%s3414_s1 + $0x160] ss:$8 sps:$4 sm:$0xff] (!%p244_p9)   ;;  %v2449_v17 = vld [vmem:[%s3414_s1 + $0x174] ss:$8 sps:$4 sm:$0xff] (!%p244_p9)   ;;  %v2451_v18 = vld [vmem:[%s3414_s1 + $0x170] ss:$8 sps:$4 sm:$0xff] (!%p244_p9)  }
  0x15   : > { %1192 = vmatpush1.bf16.msra.mxu0 (!%p244_p9), %v2433_v3  ;;  %v2452_v19 = vld [vmem:[%s3414_s1 + $0x184] ss:$8 sps:$4 sm:$0xff] (!%p244_p9)   ;;  %v2454_v20 = vld [vmem:[%s3414_s1 + $0x180] ss:$8 sps:$4 sm:$0xff] (!%p244_p9)   ;;  %v2455_v21 = vld [vmem:[%s3414_s1 + $0x194] ss:$8 sps:$4 sm:$0xff] (!%p244_p9)  }
  0x16   : > { %1193 = vmatprep.subr.bf16.mxu0 (!%p244_p9), %v2434_v4  ;;  %v2457_v22 = vld [vmem:[%s3414_s1 + $0x190] ss:$8 sps:$4 sm:$0xff] (!%p244_p9)   ;;  %v2458_v23 = vld [vmem:[%s3414_s1 + $0x1a4] ss:$8 sps:$4 sm:$0xff] (!%p244_p9)   ;;  %v2460_v24 = vld [vmem:[%s3414_s1 + $0x1a0] ss:$8 sps:$4 sm:$0xff] (!%p244_p9)  }
  0x17   : > { %s277_s6 = scalar_select %p276_p10, %s2763_s22, 31  ;;  %v2461_v25 = vld [vmem:[%s3414_s1 + $0x1b4] ss:$8 sps:$4 sm:$0xff]   ;;  %v2463_v26 = vld [vmem:[%s3414_s1 + $0x1b0] ss:$8 sps:$4 sm:$0xff]   ;;  %vm2661_vm1 = vmmov 0  }
  0x18   : > { %v2464_v27 = vld [vmem:[%s3414_s1 + $0x1c4] ss:$8 sps:$4 sm:$0xff]   ;;  %v2466_v28 = vld [vmem:[%s3414_s1 + $0x1c0] ss:$8 sps:$4 sm:$0xff]   ;;  %v2467_v29 = vld [vmem:[%s3414_s1 + $0x1d4] ss:$8 sps:$4 sm:$0xff]  }
  0x19   : > { %1194 = vmatpush1.bf16.msra.mxu0 %v2436_v5  ;;  %s2385_s18 = smul.u32 56, %s277_s6  ;;  %v2469_v30 = vld [vmem:[%s3414_s1 + $0x1d0] ss:$8 sps:$4 sm:$0xff]   ;;  %v2470_v31 = vld [vmem:[%s3414_s1 + $0x1e4] ss:$8 sps:$4 sm:$0xff]   ;;  %s1953_s10 = sld [smem:[#allocation2]] }
  0x1a   : > { %1195 = vmatprep.subr.bf16.mxu0 %v2437_v6  ;;  %v2521_v32 = vld [vmem:[%s3414_s1 + $0x4] ss:$8 sps:$4 sm:$0xff]   ;;  %v2523_v33 = vld [vmem:[%s3414_s1] ss:$8 sps:$4 sm:$0xff]   ;;  %v2527_v35 = vld [vmem:[%s3414_s1 + $0x14] ss:$8 sps:$4 sm:$0xff]  }
  0x1b   : > { %s2791_s30 = scalar_lea.vmem %s3413_s0, %s2385_s18  ;;  %1076 = vmatprep.subr.bf16.mxu1 %v2521_v32  ;;  %v2472_v34 = vld [vmem:[%s3414_s1 + $0x1e0] ss:$8 sps:$4 sm:$0xff]   ;;  %v2473_v36 = vld [vmem:[%s3414_s1 + $0x1f4] ss:$8 sps:$4 sm:$0xff]   ;;  %v2529_v37 = vld [vmem:[%s3414_s1 + $0x10] ss:$8 sps:$4 sm:$0xff]   ;;  %s3371_s18 = scalar_lea.hbm %s3420_s7, %s2763_s22 }
  0x1c   : > { %v286_v13 = vld [vmem:[%s2791_s30 + $0x18] sm:$0xff]  ;;  %v293_v14 = vld [vmem:[%s2791_s30 + $0x50] sm:$0xff]  ;;  %1077 = vmatpush1.bf16.msra.mxu1 %v2523_v33  ;;  %v292_v40 = vld [vmem:[%s2791_s30 + $0x48] sm:$0xff]  ;;  %s273_s6 = sand.u32 1, %s2649_s27  }
  0x1d   : > { %1196 = vmatpush1.bf16.msra.mxu0 %v2439_v7  ;;  %v398_v15 = vpack.c.bf16 %v293_v14, %v286_v13  ;;  %v2475_v38 = vld [vmem:[%s3414_s1 + $0x1f0] ss:$8 sps:$4 sm:$0xff]   ;;  %1078 = vmatprep.subr.bf16.mxu1 %v2527_v35  ;;  %v2478_v41 = vld [vmem:[%s3414_s1 + $0x204] ss:$8 sps:$4 sm:$0xff]   ;;  %v2532_v45 = vld [vmem:[%s3414_s1 + $0x20] ss:$8 sps:$4 sm:$0xff]  }
  0x1e   : > { %1197 = vmatprep.subr.bf16.mxu0 %v2440_v8  ;;  %v285_v39 = vld [vmem:[%s2791_s30 + $0x10] sm:$0xff]  ;;  %v300_v42 = vld [vmem:[%s2791_s30 + $0x88] sm:$0xff]  ;;  %v307_v44 = vld [vmem:[%s2791_s30 + $0xc0] sm:$0xff]  ;;  %s274_s14 = scalar_lea.vmem [#allocation3], %s273_s6  ;;  %s1964_s19 = scalar_lea.sflag [#allocation4], %s273_s6 }
  0x1f   : > { %1221 = vmatprep.mubr.bf16.mxu0 %v398_v15  ;;  %v2530_v43 = vld [vmem:[%s3414_s1 + $0x24] ss:$8 sps:$4 sm:$0xff]   ;;  %v2536_v46 = vld [vmem:[%s3414_s1 + $0x34] ss:$8 sps:$4 sm:$0xff]   ;;  %v397_v47 = vpack.c.bf16 %v292_v40, %v285_v39  ;;  %v2476_v48 = vld [vmem:[%s3414_s1 + $0x200] ss:$8 sps:$4 sm:$0xff]   ;;  %v405_v50 = vpack.c.bf16 %v307_v44, %v300_v42 }
  0x20   : > { %1079 = vmatpush1.bf16.msra.mxu1 %v2529_v37  ;;  %v2481_v49 = vld [vmem:[%s3414_s1 + $0x214] ss:$8 sps:$4 sm:$0xff]   ;;  %v2538_v51 = vld [vmem:[%s3414_s1 + $0x30] ss:$8 sps:$4 sm:$0xff]   ;;  %v299_v53 = vld [vmem:[%s2791_s30 + $0x80] sm:$0xff]  ;;  %s1976_s15 = sshll.u32 %s274_s14, 4  ;;  %s3373_s15 = int_to_ptr.vmem [resolvable:$true] %s1976_s15 }
  0x21   : > { %1198 = vmatpush1.bf16.msra.mxu0 %v2442_v9  ;;  %1080 = vmatprep.subr.bf16.mxu1 %v2530_v43  ;;  %v2479_v52 = vld [vmem:[%s3414_s1 + $0x210] ss:$8 sps:$4 sm:$0xff]   ;;  %v2539_v54 = vld [vmem:[%s3414_s1 + $0x44] ss:$8 sps:$4 sm:$0xff]   ;;  %v2541_v59 = vld [vmem:[%s3414_s1 + $0x40] ss:$8 sps:$4 sm:$0xff]  }
  0x22   : > { %1199 = vmatprep.subr.bf16.mxu0 %v2443_v10  ;;  %v306_v55 = vld [vmem:[%s2791_s30 + $0xb8] sm:$0xff]  ;;  %v2484_v56 = vld [vmem:[%s3414_s1 + $0x224] ss:$8 sps:$4 sm:$0xff]   ;;  %v321_v58 = vld [vmem:[%s2791_s30 + $0x130] sm:$0xff]  ;;  %s2595_s20 = scalar_lea.vmem %s3373_s15, 16 }
  0x23   : > { %v314_v57 = vld [vmem:[%s2791_s30 + $0xf8] sm:$0xff]  ;;  %v404_v61 = vpack.c.bf16 %v306_v55, %v299_v53  ;;  %v2482_v62 = vld [vmem:[%s3414_s1 + $0x220] ss:$8 sps:$4 sm:$0xff]   ;;  %v313_v3 = vld [vmem:[%s2791_s30 + $0xf0] sm:$0xff]  ;;  %p2596_p11 = scmp.ne.s32.totalorder %s3373_s15, %s2595_s20 }
  0x24   : > { %1081 = vmatpush1.bf16.msra.mxu1 %v2532_v45  ;;  %v2542_v60 = vld [vmem:[%s3414_s1 + $0x54] ss:$8 sps:$4 sm:$0xff]   ;;  %v412_v0 = vpack.c.bf16 %v321_v58, %v314_v57  ;;  %v2544_v1 = vld [vmem:[%s3414_s1 + $0x50] ss:$8 sps:$4 sm:$0xff]   ;;  %v2545_v4 = vld [vmem:[%s3414_s1 + $0x64] ss:$8 sps:$4 sm:$0xff]  }
  0x25   : > { %1200 = vmatpush1.bf16.msra.mxu0 %v2445_v11  ;;  %1082 = vmatprep.subr.bf16.mxu1 %v2536_v46  ;;  %v2487_v63 = vld [vmem:[%s3414_s1 + $0x234] ss:$8 sps:$4 sm:$0xff]   ;;  %v2485_v2 = vld [vmem:[%s3414_s1 + $0x230] ss:$8 sps:$4 sm:$0xff]   ;;  %v320_v5 = vld [vmem:[%s2791_s30 + $0x128] sm:$0xff]  ;;  %p2597_p12 = pnand %p2596_p11, %p2741_p5 }
  0x26   : > { %1201 = vmatprep.subr.bf16.mxu0 %v2446_v12  ;;  %v2490_v6 = vld [vmem:[%s3414_s1 + $0x244] ss:$8 sps:$4 sm:$0xff]   ;;  %v2547_v9 = vld [vmem:[%s3414_s1 + $0x60] ss:$8 sps:$4 sm:$0xff]   ;;  %v2548_v10 = vld [vmem:[%s3414_s1 + $0x74] ss:$8 sps:$4 sm:$0xff]   ;;  %v411_v11 = vpack.c.bf16 %v320_v5, %v313_v3 }
  0x27   : > { %v328_v7 = vld [vmem:[%s2791_s30 + $0x168] sm:$0xff]  ;;  %v335_v8 = vld [vmem:[%s2791_s30 + $0x1a0] sm:$0xff]  ;;  %v2493_v13 = vld [vmem:[%s3414_s1 + $0x254] ss:$8 sps:$4 sm:$0xff]   ;;  %p2598_p13 = pneg %p2597_p12 }
  0x28   : > { %1083 = vmatpush1.bf16.msra.mxu1 %v2538_v51  ;;  %v2488_v12 = vld [vmem:[%s3414_s1 + $0x240] ss:$8 sps:$4 sm:$0xff]   ;;  %v419_v14 = vpack.c.bf16 %v335_v8, %v328_v7  ;;  %v2550_v15 = vld [vmem:[%s3414_s1 + $0x70] ss:$8 sps:$4 sm:$0xff]   ;;  %v2557_v33 = vld [vmem:[%s3414_s1 + $0xa4] ss:$8 sps:$4 sm:$0xff]  }
  0x29   : > { %1202 = vmatpush1.bf16.msra.mxu0 %v2448_v16  ;;  %1084 = vmatprep.subr.bf16.mxu1 %v2539_v54  ;;  %v2491_v16 = vld [vmem:[%s3414_s1 + $0x250] ss:$8 sps:$4 sm:$0xff]   ;;  %v2502_v37 = vld [vmem:[%s3414_s1 + $0x284] ss:$8 sps:$4 sm:$0xff]   ;;  %v2559_v40 = vld [vmem:[%s3414_s1 + $0xa0] ss:$8 sps:$4 sm:$0xff]  }
  0x2a   : > { %1203 = vmatprep.subr.bf16.mxu0 %v2449_v17  ;;  %v327_v17 = vld [vmem:[%s2791_s30 + $0x160] sm:$0xff]  ;;  %v341_v35 = vld [vmem:[%s2791_s30 + $0x1d0] sm:$0xff] }
  0x2b   : > { %v363_v39 = vld [vmem:[%s2791_s30 + $0x280] sm:$0xff]  ;;  %v2505_v45 = vld [vmem:[%s3414_s1 + $0x294] ss:$8 sps:$4 sm:$0xff]   ;;  %v2562_v46 = vld [vmem:[%s3414_s1 + $0xb0] ss:$8 sps:$4 sm:$0xff]  }
  0x2c   : > { %1085 = vmatpush1.bf16.msra.mxu1 %v2541_v59  ;;  %v2500_v43 = vld [vmem:[%s3414_s1 + $0x280] ss:$8 sps:$4 sm:$0xff]   ;;  %v2508_v51 = vld [vmem:[%s3414_s1 + $0x2a4] ss:$8 sps:$4 sm:$0xff]   ;;  %v377_v53 = vld [vmem:[%s2791_s30 + $0x2f0] sm:$0xff] }
  0x2d   : > { %1204 = vmatpush1.bf16.msra.mxu0 %v2451_v18  ;;  %1086 = vmatprep.subr.bf16.mxu1 %v2542_v60  ;;  %v2551_v18 = vld [vmem:[%s3414_s1 + $0x84] ss:$8 sps:$4 sm:$0xff]   ;;  %v2565_v54 = vld [vmem:[%s3414_s1 + $0xc0] ss:$8 sps:$4 sm:$0xff]   ;;  %v2566_v55 = vld [vmem:[%s3414_s1 + $0xd4] ss:$8 sps:$4 sm:$0xff]  }
  0x2e   : > { %1205 = vmatprep.subr.bf16.mxu0 %v2452_v19  ;;  %v334_v19 = vld [vmem:[%s2791_s30 + $0x198] sm:$0xff]  ;;  %v391_v3 = vld [vmem:[%s2791_s30 + $0x360] sm:$0xff] }
  0x2f   : > { %v2511_v58 = vld [vmem:[%s3414_s1 + $0x2b4] ss:$8 sps:$4 sm:$0xff]   ;;  %v2568_v59 = vld [vmem:[%s3414_s1 + $0xd0] ss:$8 sps:$4 sm:$0xff]   ;;  %v2512_v7 = vld [vmem:[%s3414_s1 + $0x2c0] ss:$8 sps:$4 sm:$0xff]  }
  0x30   : > { %1087 = vmatpush1.bf16.msra.mxu1 %v2544_v1  ;;  %v2514_v1 = vld [vmem:[%s3414_s1 + $0x2c4] ss:$8 sps:$4 sm:$0xff]   ;;  %v2572_v5 = vld [vmem:[%s3414_s1 + $0xf4] ss:$8 sps:$4 sm:$0xff]  }
  0x31   : > { %1206 = vmatpush1.bf16.msra.mxu0 %v2454_v20  ;;  %1088 = vmatprep.subr.bf16.mxu1 %v2545_v4  ;;  %v2496_v20 = vld [vmem:[%s3414_s1 + $0x264] ss:$8 sps:$4 sm:$0xff]   ;;  %v2571_v4 = vld [vmem:[%s3414_s1 + $0xe0] ss:$8 sps:$4 sm:$0xff]   ;;  %v2517_v8 = vld [vmem:[%s3414_s1 + $0x2d4] ss:$8 sps:$4 sm:$0xff]  }
  0x32   : > { %1207 = vmatprep.subr.bf16.mxu0 %v2455_v21  ;;  %v342_v21 = vld [vmem:[%s2791_s30 + $0x1d8] sm:$0xff] }
  0x34   : > { %1089 = vmatpush1.bf16.msra.mxu1 %v2547_v9 }
  0x35   : > { %1208 = vmatpush1.bf16.msra.mxu0 %v2457_v22  ;;  %1090 = vmatprep.subr.bf16.mxu1 %v2548_v10  ;;  %v349_v22 = vld [vmem:[%s2791_s30 + $0x210] sm:$0xff] }
  0x36   : > { %1209 = vmatprep.subr.bf16.mxu0 %v2458_v23  ;;  %v2553_v23 = vld [vmem:[%s3414_s1 + $0x80] ss:$8 sps:$4 sm:$0xff]   ;;  %v2574_v10 = vld [vmem:[%s3414_s1 + $0xf0] ss:$8 sps:$4 sm:$0xff]  }
  0x38   : > { %1091 = vmatpush1.bf16.msra.mxu1 %v2550_v15  ;;  %v2515_v15 = vld [vmem:[%s3414_s1 + $0x2d0] ss:$8 sps:$4 sm:$0xff]  }
  0x39   : > { %1210 = vmatpush1.bf16.msra.mxu0 %v2460_v24  ;;  %1092 = vmatprep.subr.bf16.mxu1 %v2551_v18  ;;  %v2554_v24 = vld [vmem:[%s3414_s1 + $0x94] ss:$8 sps:$4 sm:$0xff]  }
  0x3a   : > { %1211 = vmatprep.subr.bf16.mxu0 %v2461_v25  ;;  %v418_v25 = vpack.c.bf16 %v334_v19, %v327_v17  ;;  %v390_v17 = vld [vmem:[%s2791_s30 + $0x358] sm:$0xff]  ;;  %v2520_v19 = vld [vmem:[%s3414_s1 + $0x2e4] ss:$8 sps:$4 sm:$0xff]  }
  0x3c   : > { %1093 = vmatpush1.bf16.msra.mxu1 %v2553_v23 }
  0x3d   : > { %1212 = vmatpush1.bf16.msra.mxu0 %v2463_v26  ;;  %v284_v26 = vld [vmem:[%s2791_s30 + $0x8] sm:$0xff]  ;;  %1094 = vmatprep.subr.bf16.mxu1 %v2554_v24 }
  0x3e   : > { %1213 = vmatprep.subr.bf16.mxu0 %v2464_v27  ;;  %v2494_v27 = vld [vmem:[%s3414_s1 + $0x260] ss:$8 sps:$4 sm:$0xff]  }
  0x3f   : > { %v2518_v24 = vld [vmem:[%s3414_s1 + $0x2e0] ss:$8 sps:$4 sm:$0xff]  }
  0x41   : > { %1214 = vmatpush1.bf16.msra.mxu0 %v2466_v28  ;;  %v426_v28 = vpack.c.bf16 %v349_v22, %v342_v21  ;;  %v295_v21 = vld [vmem:[%s2791_s30 + $0x60] sm:$0xff] }
  0x42   : > { %1215 = vmatprep.subr.bf16.mxu0 %v2467_v29  ;;  %v291_v29 = vld [vmem:[%s2791_s30 + $0x40] sm:$0xff] }
  0x43   : > { %v396_v32 = vpack.c.bf16 %v291_v29, %v284_v26  ;;  %v2526_v26 = vld [vmem:[%s3414_s1 + $0x2f4] ss:$8 sps:$4 sm:$0xff]   ;;  %v312_v29 = vld [vmem:[%s2791_s30 + $0xe8] sm:$0xff] }
  0x45   : > { %1216 = vmatpush1.bf16.msra.mxu0 %v2469_v30  ;;  %v2499_v30 = vld [vmem:[%s3414_s1 + $0x274] ss:$8 sps:$4 sm:$0xff]   ;;  %1108 = vmatprep.mubr.bf16.mxu1 %v396_v32  ;;  %v2576_v32 = vld [vmem:[%s3416_s3] sm:$0xff]  }
  0x46   : > { %1217 = vmatprep.subr.bf16.mxu0 %v2470_v31  ;;  %v2556_v31 = vld [vmem:[%s3414_s1 + $0x90] ss:$8 sps:$4 sm:$0xff]  }
  0x47   : > { %1095 = vmatpush1.bf16.msra.mxu1 %v2556_v31  ;;  %v2575_v31 = vld [vmem:[%s3416_s3 + $0x40] sm:$0xff]  }
  0x48   : > { %1096 = vmatprep.subr.bf16.mxu1 %v2557_v33  ;;  %v2577_v33 = vld [vmem:[%s3416_s3 + $0x48] sm:$0xff]  }
  0x49   : > { %1218 = vmatpush1.bf16.msra.mxu0 %v2472_v34  ;;  %v2497_v34 = vld [vmem:[%s3414_s1 + $0x270] ss:$8 sps:$4 sm:$0xff]  }
  0x4a   : > { %1219 = vmatprep.subr.bf16.mxu0 %v2473_v36  ;;  %v348_v36 = vld [vmem:[%s2791_s30 + $0x208] sm:$0xff] }
  0x4b   : > { %v425_v42 = vpack.c.bf16 %v348_v36, %v341_v35  ;;  %1097 = vmatpush1.bf16.msra.mxu1 %v2559_v40  ;;  %v287_v35 = vld [vmem:[%s2791_s30 + $0x20] sm:$0xff]  ;;  %v294_v36 = vld [vmem:[%s2791_s30 + $0x58] sm:$0xff]  ;;  %v309_v40 = vld [vmem:[%s2791_s30 + $0xd0] sm:$0xff] }
  0x4d   : > { %1220 = vmatpush1.bf16.msra.mxu0 %v2475_v38  ;;  %v356_v38 = vld [vmem:[%s2791_s30 + $0x248] sm:$0xff] }
  0x4e   : > { %1302 = vmatprep.subr.bf16.mxu0 %v2478_v41  ;;  %v2560_v41 = vld [vmem:[%s3414_s1 + $0xb4] ss:$8 sps:$4 sm:$0xff]   ;;  %v433_v44 = vpack.c.bf16 %v363_v39, %v356_v38  ;;  %v2535_v38 = vld [vmem:[%s3414_s1 + $0x304] ss:$8 sps:$4 sm:$0xff]  }
  0x4f   : > { %1098 = vmatprep.subr.bf16.mxu1 %v2560_v41  ;;  %v302_v39 = vld [vmem:[%s2791_s30 + $0x98] sm:$0xff] }
  0x50   : > { %1222 = vmatmul.mubr.bf16.vlgmr.msra.gmra.mrb[0].mxu0 %v397_v47  ;;  %v2503_v47 = vld [vmem:[%s3414_s1 + $0x290] ss:$8 sps:$4 sm:$0xff]   ;;  %1099 = vmatpush1.bf16.msra.mxu1 %v2562_v46  ;;  %v407_v46 = vpack.c.bf16 %v309_v40, %v302_v39 }
  0x51   : > { %1303 = vmatpush1.bf16.msra.mxu0 %v2476_v48  ;;  %1231 = vmatprep.mubr.bf16.mxu0 %v405_v50  ;;  %v355_v48 = vld [vmem:[%s2791_s30 + $0x240] sm:$0xff]  ;;  %v374_v39 = vld [vmem:[%s2791_s30 + $0x2d8] sm:$0xff] }
  0x52   : > { %1304 = vmatprep.subr.bf16.mxu0 %v2481_v49  ;;  %v362_v49 = vld [vmem:[%s2791_s30 + $0x278] sm:$0xff]  ;;  %v2563_v50 = vld [vmem:[%s3414_s1 + $0xc4] ss:$8 sps:$4 sm:$0xff]  }
  0x53   : > { %1100 = vmatprep.subr.bf16.mxu1 %v2563_v50  ;;  %v432_v57 = vpack.c.bf16 %v362_v49, %v355_v48  ;;  %v318_v48 = vld [vmem:[%s2791_s30 + $0x118] sm:$0xff]  ;;  %v333_v50 = vld [vmem:[%s2791_s30 + $0x190] sm:$0xff] }
  0x54   : > { %1101 = vmatpush1.bf16.msra.mxu1 %v2565_v54  ;;  %v326_v49 = vld [vmem:[%s2791_s30 + $0x158] sm:$0xff]  ;;  %v308_v54 = vld [vmem:[%s2791_s30 + $0xc8] sm:$0xff] }
  0x55   : > { %1305 = vmatpush1.bf16.msra.mxu0 %v2479_v52  ;;  %v370_v52 = vld [vmem:[%s2791_s30 + $0x2b8] sm:$0xff]  ;;  %1102 = vmatprep.subr.bf16.mxu1 %v2566_v55 }
  0x56   : > { %1306 = vmatprep.subr.bf16.mxu0 %v2484_v56  ;;  %v2506_v56 = vld [vmem:[%s3414_s1 + $0x2a0] ss:$8 sps:$4 sm:$0xff]   ;;  %v440_v60 = vpack.c.bf16 %v377_v53, %v370_v52  ;;  %v2581_v52 = vld [vmem:[%s3416_s3 + $0x58] sm:$0xff]   ;;  %v301_v53 = vld [vmem:[%s2791_s30 + $0x90] sm:$0xff] }
  0x57   : > { %v382_v40 = vld [vmem:[%s2791_s30 + $0x318] sm:$0xff] }
  0x58   : > { %1232 = vmatmul.mubr.bf16.gmra.mrb[4].mxu0 %v404_v61  ;;  %v2509_v61 = vld [vmem:[%s3414_s1 + $0x2b0] ss:$8 sps:$4 sm:$0xff]   ;;  %1103 = vmatpush1.bf16.msra.mxu1 %v2568_v59 }
  0x59   : > { %1307 = vmatpush1.bf16.msra.mxu0 %v2482_v62  ;;  %1241 = vmatprep.mubr.bf16.mxu0 %v412_v0  ;;  %v369_v62 = vld [vmem:[%s2791_s30 + $0x2b0] sm:$0xff]  ;;  %v2569_v0 = vld [vmem:[%s3414_s1 + $0xe4] ss:$8 sps:$4 sm:$0xff]   ;;  %v2582_v59 = vld [vmem:[%s3416_s3 + $0x18] sm:$0xff]  }
  0x5a   : > { %1308 = vmatprep.subr.bf16.mxu0 %v2487_v63  ;;  %v376_v63 = vld [vmem:[%s2791_s30 + $0x2e8] sm:$0xff]  ;;  %1104 = vmatprep.subr.bf16.mxu1 %v2569_v0 }
  0x5b   : > { %v332_v0 = vld [vmem:[%s2791_s30 + $0x188] sm:$0xff] }
  0x5c   : > { %1105 = vmatpush1.bf16.msra.mxu1 %v2571_v4  ;;  %v2585_v4 = vld [vmem:[%s3416_s3 + $0x68] sm:$0xff]  }
  0x5d   : > { %1309 = vmatpush1.bf16.msra.mxu0 %v2485_v2  ;;  %v384_v2 = vld [vmem:[%s2791_s30 + $0x328] sm:$0xff]  ;;  %1106 = vmatprep.subr.bf16.mxu1 %v2572_v5  ;;  %v315_v5 = vld [vmem:[%s2791_s30 + $0x100] sm:$0xff] }
  0x5e   : > { %1310 = vmatprep.subr.bf16.mxu0 %v2490_v6  ;;  %v439_v6 = vpack.c.bf16 %v376_v63, %v369_v62  ;;  %v447_v9 = vpack.c.bf16 %v391_v3, %v384_v2  ;;  %v325_v63 = vld [vmem:[%s2791_s30 + $0x150] sm:$0xff]  ;;  %v347_v2 = vld [vmem:[%s2791_s30 + $0x200] sm:$0xff] }
  0x5f   : > { %v2584_v3 = vld [vmem:[%s3416_s3 + $0x20] sm:$0xff]  }
  0x60   : > { %1242 = vmatmul.mubr.bf16.gmra.mrb[8].mxu0 %v411_v11  ;;  %v283_v11 = vld [vmem:[%s2791_s30] sm:$0xff]  ;;  %1107 = vmatpush1.bf16.msra.mxu1 %v2574_v10 }
  0x61   : > { %1311 = vmatpush1.bf16.msra.mxu0 %v2488_v12  ;;  %1251 = vmatprep.mubr.bf16.mxu0 %v419_v14  ;;  %v290_v12 = vld [vmem:[%s2791_s30 + $0x38] sm:$0xff]  ;;  %v305_v14 = vld [vmem:[%s2791_s30 + $0xb0] sm:$0xff] }
  0x62   : > { %1312 = vmatprep.subr.bf16.mxu0 %v2493_v13  ;;  %v298_v13 = vld [vmem:[%s2791_s30 + $0x78] sm:$0xff]  ;;  %v395_v18 = vpack.c.bf16 %v290_v12, %v283_v11  ;;  %2164 = vmatprep.subr.bf16.mxu1 %v2575_v31  ;;  %v2586_v11 = vld [vmem:[%s3416_s3 + $0x28] sm:$0xff]  }
  0x63   : > { %v403_v22 = vpack.c.bf16 %v305_v14, %v298_v13  ;;  %v339_v14 = vld [vmem:[%s2791_s30 + $0x1c0] sm:$0xff]  ;;  %v350_v31 = vld [vmem:[%s2791_s30 + $0x218] sm:$0xff] }
  0x64   : > { %1109 = vmatmul.mubr.bf16.vlgmr.msra.gmra.mrb[0].mxu1 %v395_v18  ;;  %v329_v18 = vld [vmem:[%s2791_s30 + $0x170] sm:$0xff] }
  0x65   : > { %1313 = vmatpush1.bf16.msra.mxu0 %v2491_v16  ;;  %v383_v16 = vld [vmem:[%s2791_s30 + $0x320] sm:$0xff]  ;;  %1118 = vmatprep.mubr.bf16.mxu1 %v403_v22 }
  0x66   : > { %1314 = vmatprep.subr.bf16.mxu0 %v2496_v20  ;;  %v288_v20 = vld [vmem:[%s2791_s30 + $0x28] sm:$0xff]  ;;  %v446_v23 = vpack.c.bf16 %v390_v17, %v383_v16  ;;  %2165 = vmatpush3.bf16.msra.mxu1 %v2576_v32  ;;  %v354_v16 = vld [vmem:[%s2791_s30 + $0x238] sm:$0xff]  ;;  %v361_v17 = vld [vmem:[%s2791_s30 + $0x270] sm:$0xff] }
  0x67   : > { %2166 = vmatprep.subr.bf16.mxu1 %v2577_v33  ;;  %v351_v22 = vld [vmem:[%s2791_s30 + $0x220] sm:$0xff]  ;;  %v358_v33 = vld [vmem:[%s2791_s30 + $0x258] sm:$0xff] }
  0x68   : > { %1252 = vmatmul.mubr.bf16.gmra.mrb[12].mxu0 %v418_v25  ;;  %v400_v25 = vpack.c.bf16 %v295_v21, %v288_v20  ;;  %v344_v21 = vld [vmem:[%s2791_s30 + $0x1e8] sm:$0xff] }
  0x69   : > { %1315 = vmatpush1.bf16.msra.mxu0 %v2494_v27  ;;  %1261 = vmatprep.mubr.bf16.mxu0 %v426_v28  ;;  %v297_v27 = vld [vmem:[%s2791_s30 + $0x70] sm:$0xff]  ;;  %v304_v28 = vld [vmem:[%s2791_s30 + $0xa8] sm:$0xff] }
  0x6a   : > { %1316 = vmatprep.subr.bf16.mxu0 %v2499_v30  ;;  %v319_v30 = vld [vmem:[%s2791_s30 + $0x120] sm:$0xff] }
  0x6b   : > { %v410_v41 = vpack.c.bf16 %v319_v30, %v312_v29  ;;  %v375_v29 = vld [vmem:[%s2791_s30 + $0x2e0] sm:$0xff] }
  0x6c   : > { %v343_v30 = vld [vmem:[%s2791_s30 + $0x1e0] sm:$0xff] }
  0x6d   : > { %1317 = vmatpush1.bf16.msra.mxu0 %v2497_v34  ;;  %v2524_v34 = vld [vmem:[%s3414_s1 + $0x2f0] ss:$8 sps:$4 sm:$0xff]  }
  0x6e   : > { %1318 = vmatprep.subr.bf16.mxu0 %v2502_v37  ;;  %v402_v37 = vpack.c.bf16 %v304_v28, %v297_v27  ;;  %v360_v27 = vld [vmem:[%s2791_s30 + $0x268] sm:$0xff] }
  0x6f   : > { %v368_v28 = vld [vmem:[%s2791_s30 + $0x2a8] sm:$0xff] }
  0x70   : > { %1262 = vmatmul.mubr.bf16.gmra.mrb[16].mxu0 %v425_v42  ;;  %v2578_v42 = vld [vmem:[%s3416_s3 + $0x8] sm:$0xff]   ;;  %1119 = vmatmul.mubr.bf16.gmra.mrb[4].mxu1 %v402_v37 }
  0x71   : > { %1319 = vmatpush1.bf16.msra.mxu0 %v2500_v43  ;;  %1271 = vmatprep.mubr.bf16.mxu0 %v433_v44  ;;  %v399_v43 = vpack.c.bf16 %v294_v36, %v287_v35  ;;  %v2579_v44 = vld [vmem:[%s3416_s3 + $0x50] sm:$0xff]   ;;  %v438_v35 = vpack.c.bf16 %v375_v29, %v368_v28  ;;  %v427_v36 = vpack.c.bf16 %v350_v31, %v343_v30 }
  0x72   : > { %1320 = vmatprep.subr.bf16.mxu0 %v2505_v45  ;;  %v2533_v45 = vld [vmem:[%s3414_s1 + $0x300] ss:$8 sps:$4 sm:$0xff]   ;;  %1128 = vmatprep.mubr.bf16.mxu1 %v410_v41  ;;  %v389_v41 = vld [vmem:[%s2791_s30 + $0x350] sm:$0xff] }
  0x73   : > { %2167 = vmatpush3.bf16.msra.mxu1 %v2578_v42  ;;  %v357_v42 = vld [vmem:[%s2791_s30 + $0x250] sm:$0xff] }
  0x74   : > { %2168 = vmatprep.subr.bf16.mxu1 %v2579_v44 }
  0x75   : > { %1321 = vmatpush1.bf16.msra.mxu0 %v2503_v47  ;;  %v311_v47 = vld [vmem:[%s2791_s30 + $0xe0] sm:$0xff] }
  0x76   : > { %1322 = vmatprep.subr.bf16.mxu0 %v2508_v51  ;;  %v2580_v51 = vld [vmem:[%s3416_s3 + $0x10] sm:$0xff]   ;;  %v409_v55 = vpack.c.bf16 %v318_v48, %v311_v47  ;;  %v445_v47 = vpack.c.bf16 %v389_v41, %v382_v40 }
  0x77   : > { %2169 = vmatpush3.bf16.msra.mxu1 %v2580_v51  ;;  %v388_v51 = vld [vmem:[%s2791_s30 + $0x348] sm:$0xff] }
  0x78   : > { %1272 = vmatmul.mubr.bf16.gmra.mrb[20].mxu0 %v432_v57  ;;  %v323_v57 = vld [vmem:[%s2791_s30 + $0x140] sm:$0xff]  ;;  %2170 = vmatprep.subr.bf16.mxu1 %v2581_v52 }
  0x79   : > { %1323 = vmatpush1.bf16.msra.mxu0 %v2506_v56  ;;  %1281 = vmatprep.mubr.bf16.mxu0 %v440_v60  ;;  %v316_v56 = vld [vmem:[%s2791_s30 + $0x108] sm:$0xff]  ;;  %v406_v60 = vpack.c.bf16 %v308_v54, %v301_v53  ;;  %v371_v52 = vld [vmem:[%s2791_s30 + $0x2c0] sm:$0xff]  ;;  %v378_v53 = vld [vmem:[%s2791_s30 + $0x2f8] sm:$0xff] }
  0x7a   : > { %1324 = vmatprep.subr.bf16.mxu0 %v2511_v58  ;;  %v417_v58 = vpack.c.bf16 %v333_v50, %v326_v49  ;;  %v414_v62 = vpack.c.bf16 %v323_v57, %v316_v56  ;;  %1129 = vmatmul.mubr.bf16.gmra.mrb[8].mxu1 %v409_v55  ;;  %v381_v50 = vld [vmem:[%s2791_s30 + $0x310] sm:$0xff]  ;;  %v386_v55 = vld [vmem:[%s2791_s30 + $0x338] sm:$0xff]  ;;  %v441_v57 = vpack.c.bf16 %v378_v53, %v371_v52 }
  0x7b   : > { %2171 = vmatpush3.bf16.msra.mxu1 %v2582_v59  ;;  %v444_v54 = vpack.c.bf16 %v388_v51, %v381_v50  ;;  %v393_v56 = vld [vmem:[%s2791_s30 + $0x370] sm:$0xff] }
  0x7c   : > { %1138 = vmatprep.mubr.bf16.mxu1 %v417_v58  ;;  %v449_v58 = vpack.c.bf16 %v393_v56, %v386_v55  ;;  %v385_v59 = vld [vmem:[%s2791_s30 + $0x330] sm:$0xff]  ;;  %v551_v55 = vlaneseq }
  0x7d   : > { %1325 = vmatpush1.bf16.msra.mxu0 %v2509_v61  ;;  %v2583_v61 = vld [vmem:[%s3416_s3 + $0x60] sm:$0xff]  }
  0x7e   : > { %1326 = vmatprep.subr.bf16.mxu0 %v2514_v1  ;;  %v340_v1 = vld [vmem:[%s2791_s30 + $0x1c8] sm:$0xff]  ;;  %2172 = vmatprep.subr.bf16.mxu1 %v2583_v61 }
  0x7f   : > { %v424_v10 = vpack.c.bf16 %v347_v2, %v340_v1  ;;  %2173 = vmatpush3.bf16.msra.mxu1 %v2584_v3  ;;  %v303_v2 = vld [vmem:[%s2791_s30 + $0xa0] sm:$0xff]  ;;  %v310_v3 = vld [vmem:[%s2791_s30 + $0xd8] sm:$0xff] }
  0x80   : > { %1282 = vmatmul.mubr.bf16.gmra.mrb[24].mxu0 %v439_v6  ;;  %v322_v6 = vld [vmem:[%s2791_s30 + $0x138] sm:$0xff]  ;;  %2174 = vmatprep.subr.bf16.mxu1 %v2585_v4  ;;  %v408_v4 = vpack.c.bf16 %v310_v3, %v303_v2 }
  0x81   : > { %1327 = vmatpush1.bf16.msra.mxu0 %v2512_v7  ;;  %1291 = vmatprep.mubr.bf16.mxu0 %v447_v9  ;;  %v416_v7 = vpack.c.bf16 %v332_v0, %v325_v63  ;;  %v337_v9 = vld [vmem:[%s2791_s30 + $0x1b0] sm:$0xff]  ;;  %v413_v12 = vpack.c.bf16 %v322_v6, %v315_v5  ;;  %v296_v0 = vld [vmem:[%s2791_s30 + $0x68] sm:$0xff] }
  0x82   : > { %1328 = vmatprep.subr.bf16.mxu0 %v2517_v8  ;;  %v330_v8 = vld [vmem:[%s2791_s30 + $0x178] sm:$0xff]  ;;  %v289_v63 = vld [vmem:[%s2791_s30 + $0x30] sm:$0xff]  ;;  %v324_v6 = vld [vmem:[%s2791_s30 + $0x148] sm:$0xff] }
  0x83   : > { %v421_v13 = vpack.c.bf16 %v337_v9, %v330_v8  ;;  %1139 = vmatmul.mubr.bf16.gmra.mrb[12].mxu1 %v416_v7  ;;  %v401_v1 = vpack.c.bf16 %v296_v0, %v289_v63  ;;  %v317_v5 = vld [vmem:[%s2791_s30 + $0x110] sm:$0xff]  ;;  %v331_v8 = vld [vmem:[%s2791_s30 + $0x180] sm:$0xff]  ;;  %v338_v9 = vld [vmem:[%s2791_s30 + $0x1b8] sm:$0xff] }
  0x84   : > { %1148 = vmatprep.mubr.bf16.mxu1 %v424_v10  ;;  %2175 = vmatpush3.bf16.msra.mxu1 %v2586_v11  ;;  %v415_v7 = vpack.c.bf16 %v324_v6, %v317_v5  ;;  %v422_v10 = vpack.c.bf16 %v338_v9, %v331_v8  ;;  %v345_v11 = vld [vmem:[%s2791_s30 + $0x1f0] sm:$0xff] }
  0x85   : > { %1329 = vmatpush1.bf16.msra.mxu0 %v2515_v15  ;;  %v346_v15 = vld [vmem:[%s2791_s30 + $0x1f8] sm:$0xff] }
  0x86   : > { %1330 = vmatprep.subr.bf16.mxu0 %v2520_v19  ;;  %v336_v19 = vld [vmem:[%s2791_s30 + $0x1a8] sm:$0xff]  ;;  %v423_v20 = vpack.c.bf16 %v346_v15, %v339_v14  ;;  %v359_v14 = vld [vmem:[%s2791_s30 + $0x260] sm:$0xff]  ;;  %v366_v15 = vld [vmem:[%s2791_s30 + $0x298] sm:$0xff] }
  0x88   : > { %1292 = vmatmul.mubr.bf16.gmra.mrb[28].mxu0 %v446_v23  ;;  %v431_v23 = vpack.c.bf16 %v361_v17, %v354_v16  ;;  %v436_v16 = vpack.c.bf16 %v366_v15, %v359_v14  ;;  %v373_v17 = vld [vmem:[%s2791_s30 + $0x2d0] sm:$0xff] }
  0x89   : > { %1331 = vmatpush1.bf16.msra.mxu0 %v2518_v24  ;;  %1334 = vmatprep.mubr.bf16.mxu0 %v400_v25  ;;  %v420_v24 = vpack.c.bf16 %v336_v19, %v329_v18  ;;  %v428_v25 = vpack.c.bf16 %v351_v22, %v344_v21  ;;  %v380_v18 = vld [vmem:[%s2791_s30 + $0x308] sm:$0xff]  ;;  %v394_v21 = vld [vmem:[%s2791_s30 + $0x378] sm:$0xff] }
  0x8a   : > { %1332 = vmatprep.subr.bf16.mxu0 %v2526_v26  ;;  %v353_v26 = vld [vmem:[%s2791_s30 + $0x230] sm:$0xff]  ;;  %v443_v19 = vpack.c.bf16 %v380_v18, %v373_v17 }
  0x8b   : > { %1149 = vmatmul.mubr.bf16.gmra.mrb[16].mxu1 %v423_v20  ;;  %v430_v32 = vpack.c.bf16 %v360_v27, %v353_v26  ;;  %v387_v20 = vld [vmem:[%s2791_s30 + $0x340] sm:$0xff]  ;;  %v2590_v26 = vld [vmem:[%s3416_s3 + $0x38] sm:$0xff]  }
  0x8c   : > { %1158 = vmatprep.mubr.bf16.mxu1 %v431_v23  ;;  %v450_v22 = vpack.c.bf16 %v394_v21, %v387_v20  ;;  %v2587_v23 = vld [vmem:[%s3416_s3 + $0x70] sm:$0xff]  }
  0x8d   : > { %1333 = vmatpush1.bf16.msra.mxu0 %v2524_v34  ;;  %v365_v34 = vld [vmem:[%s2791_s30 + $0x290] sm:$0xff]  ;;  %2176 = vmatprep.subr.bf16.mxu1 %v2587_v23 }
  0x8e   : > { %1415 = vmatprep.subr.bf16.mxu0 %v2535_v38  ;;  %v435_v37 = vpack.c.bf16 %v365_v34, %v358_v33  ;;  %v367_v38 = vld [vmem:[%s2791_s30 + $0x2a0] sm:$0xff] }
  0x8f   : > { %v437_v44 = vpack.c.bf16 %v374_v39, %v367_v38 }
  0x90   : > { %1335 = vmatmul.mubr.bf16.vlgmr.msra.gmra.mrb[0].mxu0 %v399_v43  ;;  %v364_v43 = vld [vmem:[%s2791_s30 + $0x288] sm:$0xff] }
  0x91   : > { %1416 = vmatpush1.bf16.msra.mxu0 %v2533_v45  ;;  %1344 = vmatprep.mubr.bf16.mxu0 %v407_v46  ;;  %v372_v45 = vld [vmem:[%s2791_s30 + $0x2c8] sm:$0xff]  ;;  %v379_v46 = vld [vmem:[%s2791_s30 + $0x300] sm:$0xff]  ;;  %v434_v48 = vpack.c.bf16 %v364_v43, %v357_v42 }
  0x92   : > { %v442_v49 = vpack.c.bf16 %v379_v46, %v372_v45 }
  0x93   : > { %1159 = vmatmul.mubr.bf16.gmra.mrb[20].mxu1 %v430_v32 }
  0x94   : > { %1168 = vmatprep.mubr.bf16.mxu1 %v438_v35 }
  0x98   : > { %1345 = vmatmul.mubr.bf16.gmra.mrb[4].mxu0 %v406_v60  ;;  %v392_v60 = vld [vmem:[%s2791_s30 + $0x368] sm:$0xff] }
  0x99   : > { %1354 = vmatprep.mubr.bf16.mxu0 %v414_v62  ;;  %v448_v61 = vpack.c.bf16 %v392_v60, %v385_v59  ;;  %v2659_v62 = vmov 0   ;;  %v552_v60 = vshrl.u32 %v551_v55, 7 }
  0x9b   : > { %1169 = vmatmul.mubr.bf16.gmra.mrb[24].mxu1 %v437_v44  ;;  %v557_v63 = vsub.s32 1, %v552_v60 }
  0x9c   : > { %1178 = vmatprep.mubr.bf16.mxu1 %v445_v47 }
  0xa0   : > { %1355 = vmatmul.mubr.bf16.gmra.mrb[8].mxu0 %v413_v12  ;;  %v352_v12 = vld [vmem:[%s2791_s30 + $0x228] sm:$0xff]  ;;  %s2662_s30 = smov [#allocation3]  }
  0xa1   : > { %1364 = vmatprep.mubr.bf16.mxu0 %v421_v13  ;;  %v429_v13 = vpack.c.bf16 %v352_v12, %v345_v11  ;;  %s2599_s21 = sshll.u32 %s2662_s30, 4  ;;  %s2600_s21 = int_to_ptr.vmem [resolvable:$false] %s2599_s21 }
  0xa2   : > { %s2601_s23 = scalar_lea.vmem %s2600_s21, 32  ;;  %p2602_p0 = scmp.lt.s32.totalorder %s3373_s15, %s2600_s21 }
  0xa3   : > { %1179 = vmatmul.mubr.bf16.gmra.mrb[28].mxu1 %v444_v54  ;;  %p2603_p1 = scmp.lt.s32.totalorder %s2601_s23, %s2595_s20 }
  0xa5   : > { %p2604_p2 = por %p2603_p1, %p2602_p0 }
  0xa7   : > { %p2605_p3 = pnand %p2604_p2, %p2598_p13 }
  0xa8   : > { %1365 = vmatmul.mubr.bf16.gmra.mrb[12].mxu0 %v420_v24  ;;  %v2588_v24 = vld [vmem:[%s3416_s3 + $0x30] sm:$0xff]  }
  0xa9   : > { %1374 = vmatprep.mubr.bf16.mxu0 %v428_v25  ;;  %2177 = vmatpush3.bf16.msra.mxu1 %v2588_v24  ;;  %v2589_v25 = vld [vmem:[%s3416_s3 + $0x78] sm:$0xff]  }
  0xaa   : > { %2178 = vmatprep.subr.bf16.mxu1 %v2589_v25 }
  0xad   : > { %2179 = vmatpush3.bf16.msra.mxu1 %v2590_v26 }
  0xb0   : > { %1375 = vmatmul.mubr.bf16.gmra.mrb[16].mxu0 %v427_v36 }
  0xb1   : > { %1384 = vmatprep.mubr.bf16.mxu0 %v435_v37 }
  0xb8   : > { %1385 = vmatmul.mubr.bf16.gmra.mrb[20].mxu0 %v434_v48 }
  0xb9   : > { %1394 = vmatprep.mubr.bf16.mxu0 %v442_v49 }
  0xc0   : > { %1395 = vmatmul.mubr.bf16.gmra.mrb[24].mxu0 %v441_v57 }
  0xc1   : > { %1404 = vmatprep.mubr.bf16.mxu0 %v449_v58 }
  0xc8   : > { %1405 = vmatmul.mubr.bf16.gmra.mrb[28].mxu0 %v448_v61  ;;  %v553_v61 = vsub.s32 0, %v552_v60 }
  0xc9   : > { %1447 = vmatprep.mubr.bf16.mxu0 %v2659_v62 }
  0xd0   : > { %2135 = vmatmul.mubr.msk.bf16.vlgmr.msra.gmra.mrb[0].mxu0 %vm1051_vm0, %v401_v1 }
  0xd1   : > { %1457 = vmatprep.mubr.bf16.mxu0 %v2659_v62 }
  0xd8   : > { %2136 = vmatmul.mubr.msk.bf16.gmra.mrb[4].mxu0 %vm1051_vm0, %v408_v4 }
  0xd9   : > { %1467 = vmatprep.mubr.bf16.mxu0 %v2659_v62 }
  0xe0   : > { %2137 = vmatmul.mubr.msk.bf16.gmra.mrb[8].mxu0 %vm1051_vm0, %v415_v7 }
  0xe1   : > { %1477 = vmatprep.mubr.bf16.mxu0 %v2659_v62 }
  0xe8   : > { %2138 = vmatmul.mubr.msk.bf16.gmra.mrb[12].mxu0 %vm1051_vm0, %v422_v10 }
  0xe9   : > { %1487 = vmatprep.mubr.bf16.mxu0 %v2659_v62 }
  0xf0   : > { %2139 = vmatmul.mubr.msk.bf16.gmra.mrb[16].mxu0 %vm1051_vm0, %v429_v13 }
  0xf1   : > { %1497 = vmatprep.mubr.bf16.mxu0 %v2659_v62 }
  0xf8   : > { %2140 = vmatmul.mubr.msk.bf16.gmra.mrb[20].mxu0 %vm1051_vm0, %v436_v16 }
  0xf9   : > { %1507 = vmatprep.mubr.bf16.mxu0 %v2659_v62 }
 0x100   : > { %2141 = vmatmul.mubr.msk.bf16.gmra.mrb[24].mxu0 %vm1051_vm0, %v443_v19 }
 0x101   : > { %1517 = vmatprep.mubr.bf16.mxu0 %v2659_v62  ;;  %v549_v62 = vld [vmem:[%s3415_s2] sm:$0x3] }
 0x102   : > { %v3273_v0 = vrot.slane %v549_v62, %v553_v61  ;;  %v3275_v1 = vrot.slane %v549_v62, %v557_v63 }
 0x108   : > { %2142 = vmatmul.mubr.msk.bf16.gmra.mrb[28].mxu0 %vm1051_vm0, %v450_v22 }
 0x137   : > { %v1110_v27 = vpop.f32.mrb[0].mxu1 }
 0x138   : > { %v1112_v28 = vpop.f32.mrb[1].mxu1  ;;  %v1111_v2 = vadd.f32 %v1110_v27, %v3273_v0 }
 0x139   : > { %v1114_v29 = vpop.f32.mrb[2].mxu1  ;;  %v1113_v3 = vadd.f32 %v1112_v28, %v3275_v1 }
 0x13a   : > { %v1116_v30 = vpop.f32.mrb[3].mxu1  ;;  %v1115_v5 = vadd.f32 %v1114_v29, %v3273_v0 }
 0x13b   : > { %v1117_v8 = vadd.f32 %v1116_v30, %v3275_v1 }
 0x143   : > { %v1120_v31 = vpop.f32.mrb[4].mxu1 }
 0x144   : > { %v1122_v32 = vpop.f32.mrb[5].mxu1  ;;  %v1121_v17 = vadd.f32 %v1120_v31, %v3273_v0 }
 0x145   : > { %v1124_v33 = vpop.f32.mrb[6].mxu1  ;;  %v1123_v19 = vadd.f32 %v1122_v32, %v3275_v1 }
 0x146   : > { %v1126_v34 = vpop.f32.mrb[7].mxu1  ;;  %v1125_v26 = vadd.f32 %v1124_v33, %v3273_v0 }
 0x147   : > { %v1127_v29 = vadd.f32 %v1126_v34, %v3275_v1 }
 0x14d   : > { %v3222_v35 = vpop.f32.mrb[8].mxu1 }
 0x14e   : > { %v3224_v36 = vpop.f32.mrb[9].mxu1 }
 0x14f   : > { %v3226_v37 = vpop.f32.mrb[10].mxu1  ;;  %v1133_v33 = vadd.f32 %v3224_v36, %v3275_v1 }
 0x150   : > { %v3228_v38 = vpop.f32.mrb[11].mxu1 }
 0x156   : > { %v3230_v39 = vpop.f32.mrb[12].mxu1 }
 0x157   : > { %v3232_v40 = vpop.f32.mrb[13].mxu1 }
 0x158   : > { %v3234_v41 = vpop.f32.mrb[14].mxu1 }
 0x159   : > { %v3236_v42 = vpop.f32.mrb[15].mxu1 }
 0x15e   : > { %v3238_v43 = vpop.f32.mrb[16].mxu1 }
 0x15f   : > { %v3240_v44 = vpop.f32.mrb[17].mxu1 }
 0x160   : > { %v3242_v45 = vpop.f32.mrb[18].mxu1 }
 0x161   : > { %v3244_v46 = vpop.f32.mrb[19].mxu1 }
 0x166   : > { %v3246_v47 = vpop.f32.mrb[20].mxu1 }
 0x167   : > { %v3248_v48 = vpop.f32.mrb[21].mxu1 }
 0x168   : > { %v3250_v49 = vpop.f32.mrb[22].mxu1 }
 0x169   : > { %v3252_v50 = vpop.f32.mrb[23].mxu1 }
 0x16e   : > { %v3254_v51 = vpop.f32.mrb[24].mxu1 }
 0x16f   : > { %v3256_v52 = vpop.f32.mrb[25].mxu1 }
 0x170   : > { %v3258_v53 = vpop.f32.mrb[26].mxu1 }
 0x171   : > { %v3260_v54 = vpop.f32.mrb[27].mxu1 }
 0x176   : > { %v3262_v56 = vpop.f32.mrb[28].mxu1 }
 0x177   : > { %v3264_v57 = vpop.f32.mrb[29].mxu1 }
 0x178   : > { %v3266_v58 = vpop.f32.mrb[30].mxu1 }
 0x179   : > { %v3268_v59 = vpop.f32.mrb[31].mxu1 }
 0x1a3   : > { %v1449_v4 = vpop.f32.mrb[0].mxu0 }
 0x1a4   : > { %v2258_v6 = vadd.f32 %v1449_v4, %v1111_v2  ;;  %v1451_v7 = vpop.f32.mrb[1].mxu0 }
 0x1a5   : > { %v2260_v9 = vadd.f32 %v1451_v7, %v1113_v3  ;;  %v1453_v10 = vpop.f32.mrb[2].mxu0  ;;  %v1131_v3 = vadd.f32 %v3222_v35, %v3273_v0 }
 0x1a6   : > { %v1528_v11 = vmul.f32 0.2, %v2258_v6  ;;  %v2262_v12 = vadd.f32 %v1453_v10, %v1115_v5  ;;  %v1455_v13 = vpop.f32.mrb[3].mxu0 }
 0x1a7   : > { %v1529_v14 = vmul.f32 0.2, %v2260_v9  ;;  %v2264_v15 = vadd.f32 %v1455_v13, %v1117_v8  ;;  %v1137_v13 = vadd.f32 %v3228_v38, %v3275_v1 }
 0x1a8   : > { %v1530_v16 = vmul.f32 0.2, %v2262_v12  ;;  %v1560_v20 = vmax.f32 %v2258_v6, %v1528_v11 }
 0x1a9   : > { %v1531_v18 = vmul.f32 0.2, %v2264_v15  ;;  %v1561_v22 = vmax.f32 %v2260_v9, %v1529_v14  ;;  %v1135_v9 = vadd.f32 %v3226_v37, %v3273_v0 }
 0x1aa   : > { %v1562_v21 = vmax.f32 %v2262_v12, %v1530_v16 }
 0x1ab   : > { %v1563_v23 = vmax.f32 %v2264_v15, %v1531_v18  ;;  %v1459_v24 = vpop.f32.mrb[4].mxu0 }
 0x1ac   : > { %v1592_v25 = vpack.c.bf16 %v1562_v21, %v1560_v20  ;;  %v2266_v27 = vadd.f32 %v1459_v24, %v1121_v17  ;;  %v1461_v28 = vpop.f32.mrb[5].mxu0  ;;  %v1141_v21 = vadd.f32 %v3230_v39, %v3273_v0 }
 0x1ad   : > { %v2268_v30 = vadd.f32 %v1461_v28, %v1123_v19  ;;  %v1463_v55 = vpop.f32.mrb[6].mxu0  ;;  %v1593_v60 = vpack.c.bf16 %v1563_v23, %v1561_v22  ;;  %v1143_v22 = vadd.f32 %v3232_v40, %v3275_v1 }
 0x1ae   : > { %v1532_v61 = vmul.f32 0.2, %v2266_v27  ;;  %v2270_v31 = vadd.f32 %v1463_v55, %v1125_v26  ;;  %v1465_v62 = vpop.f32.mrb[7].mxu0  ;;  %v1147_v55 = vadd.f32 %v3236_v42, %v3275_v1 }
 0x1af   : > { %v1533_v63 = vmul.f32 0.2, %v2268_v30  ;;  %v2272_v32 = vadd.f32 %v1465_v62, %v1127_v29  ;;  %1775 = vmatprep.mubr.bf16.mxu1 %v1593_v60 }
 0x1b0   : > { %v1534_v2 = vmul.f32 0.2, %v2270_v31  ;;  %1776 = vmatmul.mubr.bf16.vlgmr.msra.gmra.mrb[32].mxu1 %v1592_v25  ;;  %v1564_v5 = vmax.f32 %v2266_v27, %v1532_v61  ;;  %v1145_v27 = vadd.f32 %v3234_v41, %v3273_v0 }
 0x1b1   : > { %v1535_v4 = vmul.f32 0.2, %v2272_v32  ;;  %v1565_v6 = vmax.f32 %v2268_v30, %v1533_v63 }
 0x1b2   : > { %v1566_v34 = vmax.f32 %v2270_v31, %v1534_v2 }
 0x1b3   : > { %v1567_v7 = vmax.f32 %v2272_v32, %v1535_v4  ;;  %v1469_v8 = vpop.f32.mrb[8].mxu0  ;;  %v1153_v4 = vadd.f32 %v3240_v44, %v3275_v1 }
 0x1b4   : > { %v2274_v10 = vadd.f32 %v1469_v8, %v1131_v3  ;;  %v1471_v11 = vpop.f32.mrb[9].mxu0  ;;  %v1594_v12 = vpack.c.bf16 %v1566_v34, %v1564_v5  ;;  %v1151_v3 = vadd.f32 %v3238_v43, %v3273_v0 }
 0x1b5   : > { %v2276_v35 = vadd.f32 %v1471_v11, %v1133_v33  ;;  %v1473_v14 = vpop.f32.mrb[10].mxu0  ;;  %v1595_v15 = vpack.c.bf16 %v1567_v7, %v1565_v6  ;;  %v1155_v7 = vadd.f32 %v3242_v45, %v3273_v0  ;;  %v1157_v11 = vadd.f32 %v3244_v46, %v3275_v1 }
 0x1b6   : > { %v1536_v16 = vmul.f32 0.2, %v2274_v10  ;;  %v2278_v17 = vadd.f32 %v1473_v14, %v1135_v9  ;;  %v1475_v36 = vpop.f32.mrb[11].mxu0 }
 0x1b7   : > { %v1537_v18 = vmul.f32 0.2, %v2276_v35  ;;  %v2280_v19 = vadd.f32 %v1475_v36, %v1137_v13  ;;  %1783 = vmatprep.mubr.bf16.mxu1 %v1595_v15  ;;  %v1161_v36 = vadd.f32 %v3246_v47, %v3273_v0 }
 0x1b8   : > { %v1538_v20 = vmul.f32 0.2, %v2278_v17  ;;  %1784 = vmatmul.mubr.bf16.gmra.mrb[36].mxu1 %v1594_v12  ;;  %v1568_v23 = vmax.f32 %v2274_v10, %v1536_v16 }
 0x1b9   : > { %v1539_v37 = vmul.f32 0.2, %v2280_v19  ;;  %v1569_v24 = vmax.f32 %v2276_v35, %v1537_v18  ;;  %v1163_v18 = vadd.f32 %v3248_v48, %v3275_v1 }
 0x1ba   : > { %v1570_v38 = vmax.f32 %v2278_v17, %v1538_v20 }
 0x1bb   : > { %v1571_v25 = vmax.f32 %v2280_v19, %v1539_v37  ;;  %v1479_v26 = vpop.f32.mrb[12].mxu0 }
 0x1bc   : > { %v2282_v28 = vadd.f32 %v1479_v26, %v1141_v21  ;;  %v1481_v29 = vpop.f32.mrb[13].mxu0  ;;  %v1596_v30 = vpack.c.bf16 %v1570_v38, %v1568_v23 }
 0x1bd   : > { %v2284_v39 = vadd.f32 %v1481_v29, %v1143_v22  ;;  %v1483_v60 = vpop.f32.mrb[14].mxu0  ;;  %v1597_v61 = vpack.c.bf16 %v1571_v25, %v1569_v24  ;;  %v1165_v22 = vadd.f32 %v3250_v49, %v3273_v0  ;;  %v1167_v25 = vadd.f32 %v3252_v50, %v3275_v1 }
 0x1be   : > { %v1540_v31 = vmul.f32 0.2, %v2282_v28  ;;  %v2286_v62 = vadd.f32 %v1483_v60, %v1145_v27  ;;  %v1485_v40 = vpop.f32.mrb[15].mxu0  ;;  %v1171_v60 = vadd.f32 %v3254_v51, %v3273_v0 }
 0x1bf   : > { %v1541_v63 = vmul.f32 0.2, %v2284_v39  ;;  %v2288_v32 = vadd.f32 %v1485_v40, %v1147_v55  ;;  %1791 = vmatprep.mubr.bf16.mxu1 %v1597_v61  ;;  %v1173_v61 = vadd.f32 %v3256_v52, %v3275_v1 }
 0x1c0   : > { %v1542_v2 = vmul.f32 0.2, %v2286_v62  ;;  %1792 = vmatmul.mubr.bf16.gmra.mrb[40].mxu1 %v1596_v30  ;;  %v1572_v33 = vmax.f32 %v2282_v28, %v1540_v31 }
 0x1c1   : > { %v1543_v41 = vmul.f32 0.2, %v2288_v32  ;;  %v1573_v5 = vmax.f32 %v2284_v39, %v1541_v63 }
 0x1c2   : > { %v1574_v42 = vmax.f32 %v2286_v62, %v1542_v2 }
 0x1c3   : > { %v1575_v34 = vmax.f32 %v2288_v32, %v1543_v41  ;;  %v1489_v6 = vpop.f32.mrb[16].mxu0  ;;  %v1175_v32 = vadd.f32 %v3258_v53, %v3273_v0 }
 0x1c4   : > { %v2290_v8 = vadd.f32 %v1489_v6, %v1151_v3  ;;  %v1491_v9 = vpop.f32.mrb[17].mxu0  ;;  %v1598_v10 = vpack.c.bf16 %v1574_v42, %v1572_v33 }
 0x1c5   : > { %v2292_v43 = vadd.f32 %v1491_v9, %v1153_v4  ;;  %v1493_v12 = vpop.f32.mrb[18].mxu0  ;;  %v1599_v13 = vpack.c.bf16 %v1575_v34, %v1573_v5  ;;  %v1177_v4 = vadd.f32 %v3260_v54, %v3275_v1  ;;  %v1181_v9 = vadd.f32 %v3262_v56, %v3273_v0 }
 0x1c6   : > { %v1544_v35 = vmul.f32 0.2, %v2290_v8  ;;  %v2294_v14 = vadd.f32 %v1493_v12, %v1155_v7  ;;  %v1495_v44 = vpop.f32.mrb[19].mxu0 }
 0x1c7   : > { %v1545_v15 = vmul.f32 0.2, %v2292_v43  ;;  %v2296_v16 = vadd.f32 %v1495_v44, %v1157_v11  ;;  %1799 = vmatprep.mubr.bf16.mxu1 %v1599_v13 }
 0x1c8   : > { %v1546_v17 = vmul.f32 0.2, %v2294_v14  ;;  %1800 = vmatmul.mubr.bf16.gmra.mrb[44].mxu1 %v1598_v10  ;;  %v1576_v19 = vmax.f32 %v2290_v8, %v1544_v35  ;;  %v1183_v10 = vadd.f32 %v3264_v57, %v3275_v1  ;;  %v1185_v35 = vadd.f32 %v3266_v58, %v3273_v0 }
 0x1c9   : > { %v1547_v45 = vmul.f32 0.2, %v2296_v16  ;;  %v1577_v20 = vmax.f32 %v2292_v43, %v1545_v15 }
 0x1ca   : > { %v1578_v46 = vmax.f32 %v2294_v14, %v1546_v17 }
 0x1cb   : > { %v1579_v21 = vmax.f32 %v2296_v16, %v1547_v45  ;;  %v1499_v37 = vpop.f32.mrb[20].mxu0  ;;  %v1187_v16 = vadd.f32 %v3268_v59, %v3275_v1 }
 0x1cc   : > { %v2298_v23 = vadd.f32 %v1499_v37, %v1161_v36  ;;  %v1501_v38 = vpop.f32.mrb[21].mxu0  ;;  %v1600_v24 = vpack.c.bf16 %v1578_v46, %v1576_v19 }
 0x1cd   : > { %v2300_v47 = vadd.f32 %v1501_v38, %v1163_v18  ;;  %v1503_v26 = vpop.f32.mrb[22].mxu0  ;;  %v1601_v27 = vpack.c.bf16 %v1579_v21, %v1577_v20 }
 0x1ce   : > { %v1548_v28 = vmul.f32 0.2, %v2298_v23  ;;  %v2302_v29 = vadd.f32 %v1503_v26, %v1165_v22  ;;  %v1505_v48 = vpop.f32.mrb[23].mxu0 }
 0x1cf   : > { %v1549_v30 = vmul.f32 0.2, %v2300_v47  ;;  %v2304_v55 = vadd.f32 %v1505_v48, %v1167_v25  ;;  %1807 = vmatprep.mubr.bf16.mxu1 %v1601_v27 }
 0x1d0   : > { %v1550_v39 = vmul.f32 0.2, %v2302_v29  ;;  %1808 = vmatmul.mubr.bf16.gmra.mrb[48].mxu1 %v1600_v24  ;;  %v1580_v31 = vmax.f32 %v2298_v23, %v1548_v28  ;;  %v3336_v24 = vld [vmem:[%s3417_s4] ss:$0 sm:$0xff] }
 0x1d1   : > { %v1551_v49 = vmul.f32 0.2, %v2304_v55  ;;  %v1581_v62 = vmax.f32 %v2300_v47, %v1549_v30 }
 0x1d2   : > { %v1582_v50 = vmax.f32 %v2302_v29, %v1550_v39 }
 0x1d3   : > { %v1583_v40 = vmax.f32 %v2304_v55, %v1551_v49  ;;  %v1509_v63 = vpop.f32.mrb[24].mxu0 }
 0x1d4   : > { %v2306_v2 = vadd.f32 %v1509_v63, %v1171_v60  ;;  %v1511_v3 = vpop.f32.mrb[25].mxu0  ;;  %v1602_v41 = vpack.c.bf16 %v1582_v50, %v1580_v31 }
 0x1d5   : > { %v2308_v51 = vadd.f32 %v1511_v3, %v1173_v61  ;;  %v1513_v33 = vpop.f32.mrb[26].mxu0  ;;  %v1603_v42 = vpack.c.bf16 %v1583_v40, %v1581_v62 }
 0x1d6   : > { %v1552_v5 = vmul.f32 0.2, %v2306_v2  ;;  %v2310_v34 = vadd.f32 %v1513_v33, %v1175_v32  ;;  %v1515_v52 = vpop.f32.mrb[27].mxu0 }
 0x1d7   : > { %v1553_v6 = vmul.f32 0.2, %v2308_v51  ;;  %v2312_v7 = vadd.f32 %v1515_v52, %v1177_v4  ;;  %1815 = vmatprep.mubr.bf16.mxu1 %v1603_v42  ;;  %v2660_v4 = vmov 0.0  }
 0x1d8   : > { %v1554_v8 = vmul.f32 0.2, %v2310_v34  ;;  %1816 = vmatmul.mubr.bf16.gmra.mrb[52].mxu1 %v1602_v41  ;;  %v1584_v11 = vmax.f32 %v2306_v2, %v1552_v5  ;;  %2237 = vmatprep.subr.bf16.mxu1 %v2660_v4 }
 0x1d9   : > { %v1555_v53 = vmul.f32 0.2, %v2312_v7  ;;  %v1585_v43 = vmax.f32 %v2308_v51, %v1553_v6 }
 0x1da   : > { %v1586_v54 = vmax.f32 %v2310_v34, %v1554_v8 }
 0x1db   : > { %v1587_v12 = vmax.f32 %v2312_v7, %v1555_v53  ;;  %v1519_v13 = vpop.f32.mrb[28].mxu0 }
 0x1dc   : > { %v2314_v14 = vadd.f32 %v1519_v13, %v1181_v9  ;;  %v1521_v44 = vpop.f32.mrb[29].mxu0  ;;  %v1604_v15 = vpack.c.bf16 %v1586_v54, %v1584_v11 }
 0x1dd   : > { %v2316_v56 = vadd.f32 %v1521_v44, %v1183_v10  ;;  %v1523_v17 = vpop.f32.mrb[30].mxu0  ;;  %v1605_v36 = vpack.c.bf16 %v1587_v12, %v1585_v43 }
 0x1de   : > { %v1556_v45 = vmul.f32 0.2, %v2314_v14  ;;  %v2318_v18 = vadd.f32 %v1523_v17, %v1185_v35  ;;  %v1525_v57 = vpop.f32.mrb[31].mxu0 }
 0x1df   : > { %v1557_v19 = vmul.f32 0.2, %v2316_v56  ;;  %v2320_v46 = vadd.f32 %v1525_v57, %v1187_v16  ;;  %1823 = vmatprep.mubr.bf16.mxu1 %v1605_v36 }
 0x1e0   : > { %v1558_v20 = vmul.f32 0.2, %v2318_v18  ;;  %1824 = vmatmul.mubr.bf16.gmra.mrb[56].mxu1 %v1604_v15  ;;  %v1588_v37 = vmax.f32 %v2314_v14, %v1556_v45 }
 0x1e1   : > { %v1559_v21 = vmul.f32 0.2, %v2320_v46  ;;  %v1589_v0 = vmax.f32 %v2316_v56, %v1557_v19 }
 0x1e2   : > { %v1590_v58 = vmax.f32 %v2318_v18, %v1558_v20 }
 0x1e3   : > { %v1591_v22 = vmax.f32 %v2320_v46, %v1559_v21 }
 0x1e4   : > { %v1606_v23 = vpack.c.bf16 %v1590_v58, %v1588_v37 }
 0x1e5   : > { %v1607_v38 = vpack.c.bf16 %v1591_v22, %v1589_v0 }
 0x1e7   : > { %1831 = vmatprep.mubr.bf16.mxu1 %v1607_v38 }
 0x1e8   : > { %1832 = vmatmul.mubr.bf16.gmra.mrb[60].mxu1 %v1606_v23 }
 0x1e9   : > { %2253 = vmatprep.mubr.msk.bf16.mxu1 %vm2661_vm1, %v2660_v4 }
 0x283   : > { %v2180_v59 = vpop.f32.mrb[32].mxu1 }
 0x284   : > { %v2181_v1 = vpop.f32.mrb[33].mxu1 }
 0x285   : > { %v2182_v25 = vadd.f32 %v2181_v1, %v2180_v59  ;;  %v2183_v47 = vpop.f32.mrb[34].mxu1 }
 0x286   : > { %v2184_v26 = vpop.f32.mrb[35].mxu1 }
 0x287   : > { %v2185_v27 = vadd.f32 %v2184_v26, %v2183_v47  ;;  %v1778_v28 = vadd.f32 %v2182_v25, %v3336_v24 }
 0x289   : > { %v1781_v29 = vadd.f32 %v2185_v27, %v3336_v24  ;;  %v1840_v48 = vmul.f32 0.2, %v1778_v28 }
 0x28b   : > { %v2186_v30 = vpop.f32.mrb[36].mxu1  ;;  %v1856_v55 = vmax.f32 %v1778_v28, %v1840_v48  ;;  %v1841_v39 = vmul.f32 0.2, %v1781_v29 }
 0x28c   : > { %v2187_v60 = vpop.f32.mrb[37].mxu1 }
 0x28d   : > { %v2188_v49 = vadd.f32 %v2187_v60, %v2186_v30  ;;  %v2189_v61 = vpop.f32.mrb[38].mxu1  ;;  %1872 = vxpose.xlu0.b32.start [1/16] %v1856_v55, 128  ;;  %v1857_v40 = vmax.f32 %v1781_v29, %v1841_v39 }
 0x28e   : > { %v2190_v31 = vpop.f32.mrb[39].mxu1 }
 0x28f   : > { %v1786_v50 = vadd.f32 %v2188_v49, %v3336_v24  ;;  %v2191_v62 = vadd.f32 %v2190_v31, %v2189_v61 }
 0x291   : > { %v1789_v63 = vadd.f32 %v2191_v62, %v3336_v24  ;;  %1873 = vxpose.xlu0.b32.cont [2/16] %v1857_v40, 128  ;;  %v1842_v32 = vmul.f32 0.2, %v1786_v50 }
 0x293   : > { %v2192_v2 = vpop.f32.mrb[40].mxu1  ;;  %v1858_v3 = vmax.f32 %v1786_v50, %v1842_v32  ;;  %v1843_v41 = vmul.f32 0.2, %v1789_v63 }
 0x294   : > { %v2193_v51 = vpop.f32.mrb[41].mxu1 }
 0x295   : > { %v2194_v33 = vadd.f32 %v2193_v51, %v2192_v2  ;;  %v2195_v42 = vpop.f32.mrb[42].mxu1  ;;  %1874 = vxpose.xlu0.b32.cont [3/16] %v1858_v3, 128  ;;  %v1859_v6 = vmax.f32 %v1789_v63, %v1843_v41 }
 0x296   : > { %v2196_v5 = vpop.f32.mrb[43].mxu1 }
 0x297   : > { %v1794_v34 = vadd.f32 %v2194_v33, %v3336_v24  ;;  %v2197_v52 = vadd.f32 %v2196_v5, %v2195_v42 }
 0x299   : > { %v1797_v7 = vadd.f32 %v2197_v52, %v3336_v24  ;;  %1875 = vxpose.xlu0.b32.cont [4/16] %v1859_v6, 128  ;;  %v1844_v8 = vmul.f32 0.2, %v1794_v34 }
 0x29b   : > { %v2198_v9 = vpop.f32.mrb[44].mxu1  ;;  %v1860_v53 = vmax.f32 %v1794_v34, %v1844_v8  ;;  %v1845_v10 = vmul.f32 0.2, %v1797_v7 }
 0x29c   : > { %v2199_v11 = vpop.f32.mrb[45].mxu1 }
 0x29d   : > { %v2200_v54 = vadd.f32 %v2199_v11, %v2198_v9  ;;  %v2201_v43 = vpop.f32.mrb[46].mxu1  ;;  %1876 = vxpose.xlu0.b32.cont [5/16] %v1860_v53, 128  ;;  %v1861_v14 = vmax.f32 %v1797_v7, %v1845_v10 }
 0x29e   : > { %v2202_v12 = vpop.f32.mrb[47].mxu1 }
 0x29f   : > { %v1802_v13 = vadd.f32 %v2200_v54, %v3336_v24  ;;  %v2203_v35 = vadd.f32 %v2202_v12, %v2201_v43 }
 0x2a1   : > { %v1805_v44 = vadd.f32 %v2203_v35, %v3336_v24  ;;  %1877 = vxpose.xlu0.b32.cont [6/16] %v1861_v14, 128  ;;  %v1846_v15 = vmul.f32 0.2, %v1802_v13 }
 0x2a3   : > { %v2204_v16 = vpop.f32.mrb[48].mxu1  ;;  %v1862_v56 = vmax.f32 %v1802_v13, %v1846_v15  ;;  %v1847_v17 = vmul.f32 0.2, %v1805_v44 }
 0x2a4   : > { %v2205_v36 = vpop.f32.mrb[49].mxu1 }
 0x2a5   : > { %v2206_v45 = vadd.f32 %v2205_v36, %v2204_v16  ;;  %v2207_v18 = vpop.f32.mrb[50].mxu1  ;;  %1878 = vxpose.xlu0.b32.cont [7/16] %v1862_v56, 128  ;;  %v1863_v20 = vmax.f32 %v1805_v44, %v1847_v17 }
 0x2a6   : > { %v2208_v57 = vpop.f32.mrb[51].mxu1 }
 0x2a7   : > { %v1810_v19 = vadd.f32 %v2206_v45, %v3336_v24  ;;  %v2209_v46 = vadd.f32 %v2208_v57, %v2207_v18 }
 0x2a9   : > { %v1813_v21 = vadd.f32 %v2209_v46, %v3336_v24  ;;  %1879 = vxpose.xlu0.b32.cont [8/16] %v1863_v20, 128  ;;  %v1848_v37 = vmul.f32 0.2, %v1810_v19 }
 0x2ab   : > { %v2210_v58 = vpop.f32.mrb[52].mxu1  ;;  %v1864_v0 = vmax.f32 %v1810_v19, %v1848_v37  ;;  %v1849_v22 = vmul.f32 0.2, %v1813_v21 }
 0x2ac   : > { %v2211_v23 = vpop.f32.mrb[53].mxu1 }
 0x2ad   : > { %v2212_v38 = vadd.f32 %v2211_v23, %v2210_v58  ;;  %v2213_v59 = vpop.f32.mrb[54].mxu1  ;;  %1880 = vxpose.xlu0.b32.cont [9/16] %v1864_v0, 128  ;;  %v1865_v26 = vmax.f32 %v1813_v21, %v1849_v22  ;;  %v1912_v58 = vld [vmem:[%s3418_s5] sm:$0xf]  ;;  %v1954_v0 = vstv %s1953_s10 }
 0x2ae   : > { %v2214_v1 = vpop.f32.mrb[55].mxu1 }
 0x2af   : > { %v1818_v25 = vadd.f32 %v2212_v38, %v3336_v24  ;;  %v2215_v47 = vadd.f32 %v2214_v1, %v2213_v59 }
 0x2b1   : > { %v1821_v27 = vadd.f32 %v2215_v47, %v3336_v24  ;;  %1881 = vxpose.xlu0.b32.cont [10/16] %v1865_v26, 128  ;;  %v1850_v28 = vmul.f32 0.2, %v1818_v25 }
 0x2b3   : > { %v2216_v29 = vpop.f32.mrb[56].mxu1  ;;  %v1866_v48 = vmax.f32 %v1818_v25, %v1850_v28  ;;  %v1851_v30 = vmul.f32 0.2, %v1821_v27 }
 0x2b4   : > { %v2217_v55 = vpop.f32.mrb[57].mxu1 }
 0x2b5   : > { %v2218_v39 = vadd.f32 %v2217_v55, %v2216_v29  ;;  %v2219_v60 = vpop.f32.mrb[58].mxu1  ;;  %1882 = vxpose.xlu0.b32.cont [11/16] %v1866_v48, 128  ;;  %v1867_v50 = vmax.f32 %v1821_v27, %v1851_v30 }
 0x2b6   : > { %v2220_v49 = vpop.f32.mrb[59].mxu1 }
 0x2b7   : > { %v1826_v61 = vadd.f32 %v2218_v39, %v3336_v24  ;;  %v2221_v31 = vadd.f32 %v2220_v49, %v2219_v60 }
 0x2b9   : > { %v1829_v62 = vadd.f32 %v2221_v31, %v3336_v24  ;;  %1883 = vxpose.xlu0.b32.cont [12/16] %v1867_v50, 128  ;;  %v1852_v40 = vmul.f32 0.2, %v1826_v61 }
 0x2bb   : > { %v2222_v63 = vpop.f32.mrb[60].mxu1  ;;  %v1868_v32 = vmax.f32 %v1826_v61, %v1852_v40  ;;  %v1853_v2 = vmul.f32 0.2, %v1829_v62 }
 0x2bc   : > { %v2223_v3 = vpop.f32.mrb[61].mxu1 }
 0x2bd   : > { %v2224_v41 = vadd.f32 %v2223_v3, %v2222_v63  ;;  %v2225_v51 = vpop.f32.mrb[62].mxu1  ;;  %1884 = vxpose.xlu0.b32.cont [13/16] %v1868_v32, 128  ;;  %v1869_v34 = vmax.f32 %v1829_v62, %v1853_v2 }
 0x2be   : > { %v2226_v33 = vpop.f32.mrb[63].mxu1 }
 0x2bf   : > { %v1834_v42 = vadd.f32 %v2224_v41, %v3336_v24  ;;  %v2227_v5 = vadd.f32 %v2226_v33, %v2225_v51 }
 0x2c1   : > { %v1837_v52 = vadd.f32 %v2227_v5, %v3336_v24  ;;  %1885 = vxpose.xlu0.b32.cont [14/16] %v1869_v34, 128  ;;  %v1854_v6 = vmul.f32 0.2, %v1834_v42 }
 0x2c3   : > { %v1870_v7 = vmax.f32 %v1834_v42, %v1854_v6  ;;  %v1855_v8 = vmul.f32 0.2, %v1837_v52 }
 0x2c5   : > { %1886 = vxpose.xlu0.b32.cont [15/16] %v1870_v7, 128  ;;  %v1871_v9 = vmax.f32 %v1837_v52, %v1855_v8 }
 0x2c9   : > { %1887 = vxpose.xlu0.b32.end [16/16] %v1871_v9, 128 }
 0x30d   : > { %v1888_v53 = vpop.trf.xlu0 }
 0x311   : > { %v1889_v10 = vpop.trf.xlu0 }
 0x312   : > { %v1904_v11 = vpack.c.bf16 %v1889_v10, %v1888_v53 }
 0x314   : > { %2238 = vmatpush3.bf16.msra.mxu1 %v1904_v11 }
 0x315   : > { %v1890_v54 = vpop.trf.xlu0  ;;  %2239 = vmatprep.subr.bf16.mxu1 %v2660_v4 }
 0x319   : > { %v1891_v43 = vpop.trf.xlu0 }
 0x31a   : > { %v1905_v12 = vpack.c.bf16 %v1891_v43, %v1890_v54 }
 0x31c   : > { %2240 = vmatpush3.bf16.msra.mxu1 %v1905_v12 }
 0x31d   : > { %v1892_v24 = vpop.trf.xlu0  ;;  %2241 = vmatprep.subr.bf16.mxu1 %v2660_v4 }
 0x321   : > { %v1893_v13 = vpop.trf.xlu0 }
 0x322   : > { %v1906_v35 = vpack.c.bf16 %v1893_v13, %v1892_v24 }
 0x324   : > { %2242 = vmatpush3.bf16.msra.mxu1 %v1906_v35 }
 0x325   : > { %v1894_v14 = vpop.trf.xlu0  ;;  %2243 = vmatprep.subr.bf16.mxu1 %v2660_v4 }
 0x329   : > { %v1895_v44 = vpop.trf.xlu0 }
 0x32a   : > { %v1907_v15 = vpack.c.bf16 %v1895_v44, %v1894_v14 }
 0x32c   : > { %2244 = vmatpush3.bf16.msra.mxu1 %v1907_v15 }
 0x32d   : > { %v1896_v16 = vpop.trf.xlu0  ;;  %2245 = vmatprep.subr.bf16.mxu1 %v2660_v4 }
 0x331   : > { %v1897_v56 = vpop.trf.xlu0 }
 0x332   : > { %v1908_v17 = vpack.c.bf16 %v1897_v56, %v1896_v16 }
 0x334   : > { %2246 = vmatpush3.bf16.msra.mxu1 %v1908_v17 }
 0x335   : > { %v1898_v36 = vpop.trf.xlu0  ;;  %2247 = vmatprep.subr.bf16.mxu1 %v2660_v4 }
 0x339   : > { %v1899_v45 = vpop.trf.xlu0 }
 0x33a   : > { %v1909_v18 = vpack.c.bf16 %v1899_v45, %v1898_v36 }
 0x33c   : > { %2248 = vmatpush3.bf16.msra.mxu1 %v1909_v18 }
 0x33d   : > { %v1900_v57 = vpop.trf.xlu0  ;;  %2249 = vmatprep.subr.bf16.mxu1 %v2660_v4 }
 0x341   : > { %v1901_v19 = vpop.trf.xlu0 }
 0x342   : > { %v1910_v46 = vpack.c.bf16 %v1901_v19, %v1900_v57 }
 0x344   : > { %2250 = vmatpush3.bf16.msra.mxu1 %v1910_v46 }
 0x345   : > { %v1902_v20 = vpop.trf.xlu0  ;;  %2251 = vmatprep.subr.bf16.mxu1 %v2660_v4 }
 0x349   : > { %v1903_v21 = vpop.trf.xlu0 }
 0x34a   : > { %v1911_v37 = vpack.c.bf16 %v1903_v21, %v1902_v20 }
 0x34c   : > { %2252 = vmatpush3.bf16.msra.mxu1 %v1911_v37 }
 0x34f   : > { %2254 = vmatmul.mubr.bf16.vlgmr.msra.gmra.mrb[64].mxu1 %v1912_v58 }
 0x422   : > { %v1947_v22 = vpop.f32.mrb[64].mxu1 }
 0x423   : > { %v1955_v23 = vadd.f32 %v1954_v0, %v1947_v22  ;;  %v2255_v38 = vpop.f32.mrb[65].mxu1 }
 0x424   : > { %v1950_v59 = vpop.f32.mrb[66].mxu1 }
 0x425   : > { %v2160_v1 = vmul.f32 -1.442695, %v1955_v23  ;;  %v2256_v25 = vpop.f32.mrb[67].mxu1 }
 0x427   : > { %2591 = vpow2.f32 %v2160_v1 }
 0x431   : > { %v2592_v4 = vpop.eup %2591 }
 0x432   : > { %v1959_v47 = vadd.f32 1.0, %v2592_v4 }
 0x434   : > { %2593 = vrcp.f32 %v1959_v47 }
 0x43e   : > { %v2594_v26 = vpop.eup %2593 }
 0x43f   : > { %1962 = vst [vmem:[%s274_s14] sm:$0x1] %v2594_v26 }
 0x440   : > { %2608 = shalt.err (!%p2605_p3)
}
 0x441   : > { %s2609_s22 = scalar_lea.hbm %s3371_s18, 16  ;;  %s2613_s9 = scalar_lea.hbm %s3420_s7, 32 }
 0x442   : > { %p2610_p4 = scmp.ne.s32.totalorder %s3371_s18, %s2609_s22  ;;  %p2614_p9 = scmp.lt.u32.totalorder %s3371_s18, %s3420_s7 }
 0x443   : > { %p2615_p10 = scmp.lt.u32.totalorder %s2613_s9, %s2609_s22  ;;  %p2617_p12 = scmp.lt.u32.totalorder %s2609_s22, %s3371_s18 }
 0x444   : > { %p2611_p7 = pnand %p2610_p4, %p2741_p5 }
 0x445   : > { %p2616_p11 = por %p2615_p10, %p2614_p9 }
 0x446   : > { %p2612_p8 = pneg %p2611_p7 }
 0x447   : > { %p2618_p13 = por %p2617_p12, %p2616_p11 }
 0x449   : > { %p2619_p0 = pnand %p2618_p13, %p2612_p8 }
 0x44b   : > { %2622 = shalt.err (!%p2619_p0)
}
 0x44c   : > { %2386 = dma.vmem_to_hbm [thread:$0]  (%p2741_p5), %s3373_s15, 16, %s3371_s18, %s1964_s19  }
 0x44d PF: > { %p2392_p1 = scmp.ge.s32.totalorder %s2657_s29, 2  ;;  %s1988_s14 = sand.u32 1, %s2645_s26  }
 0x44e   : > { %s1989_s16 = scalar_lea.sflag [#allocation4], %s1988_s14 }
 0x44f   : > { %p2389_p2 = pnand %p2392_p1, %p2745_p6 }
 0x451   : > { %2640 = dma.done.wait (!%p2389_p2), %s1989_s16, 16  }
 0x452   : > { %2642 = vsyncadd (!%p2389_p2), %s1989_s16, 4294967280  ;;  %p18_p3 = scmp.ge.s32.totalorder %s2729_s8, 4   ;;  %s3423_s26 = smov %s2649_s27 }
 0x453   : > { %s3424_s27 = smov %s2653_s28  ;;  %s3425_s28 = smov %s2739_s11 }
 0x454   : > { %s3426_s29 = smov %s2729_s8  ;;  %20 = sbr.rel (!%p18_p3) target bundleno = 5 (0x5), region = 83 }
 0x45b   :  { %1993 = vsyncpa [#allocation4], 1 }
 0x45c   :  { %1995 = vsyncpa [#allocation4 + $0x1], 1 }

</bundles_post_ra>
